<compile_context>
chip_gen: v5e
topology: v5e:2x2
jax: 0.10.0
libtpu: 0.0.40
codegen_flags: <defaults>
</compile_context>

<pallas_src>
import functools

import jax
import jax.numpy as jnp
from jax import lax
from jax.experimental import pallas as pl
from jax.experimental.pallas import tpu as pltpu


def _bottleneck_kernel(H, W, x_ref, w1_ref, w2_ref, w3_ref, bias_ref, o_ref,
                       pad_ref):
    # x_ref:    [NB, H*W, Cin]    bf16
    # w1_ref:   [Cin, P]          bf16
    # w2_ref:   [9*P, P]          bf16   rows ordered (ky*3+kx)*P + cin
    # w3_ref:   [P, Cout]         bf16   (BN scale pre-folded)
    # bias_ref: [1, Cout]         f32    (folded BN bias)
    # o_ref:    [NB, H*W, Cout]
    # pad_ref:  [NB, H+2, W+2, P] bf16 VMEM scratch (zero border = SAME pad)
    NB, HW, Cin = x_ref.shape
    P = w1_ref.shape[1]
    Cout = w3_ref.shape[1]

    x = x_ref[...].reshape(NB * HW, Cin)                          # bf16

    # ---- conv1: 1x1 (channel matmul on MXU) + ReLU ----------------------
    h1 = jnp.dot(x, w1_ref[...], preferred_element_type=jnp.float32)
    h1 = jnp.maximum(h1, 0.0).astype(jnp.bfloat16)                # [NB*HW, P]

    # ---- conv2: 3x3 stride=1 pad=1 via padded scratch + one fused matmul
    # Zero the scratch every step (keeps the 1-pixel border at 0; also keeps
    # megacore-sharded grids correct since scratch is per-core), then write
    # h1 into the interior.  The 9 taps are static slices -- no roll, no
    # iota, no compare/select masks.
    pad_ref[...] = jnp.zeros(pad_ref.shape, pad_ref.dtype)
    pad_ref[:, 1:H + 1, 1:W + 1, :] = h1.reshape(NB, H, W, P)

    taps = []
    for dy in range(3):
        for dx in range(3):
            taps.append(pad_ref[:, dy:dy + H, dx:dx + W, :])      # [NB,H,W,P]
    big = jnp.concatenate(taps, axis=-1).reshape(NB * HW, 9 * P)  # K = 9P

    h2 = jnp.dot(big, w2_ref[...], preferred_element_type=jnp.float32)
    h2 = jnp.maximum(h2, 0.0).astype(jnp.bfloat16)                # [NB*HW, P]

    # ---- conv3: 1x1 with BN scale folded into the weight, + BN bias -----
    h3 = jnp.dot(h2, w3_ref[...], preferred_element_type=jnp.float32)
    h3 = h3 + bias_ref[...]                                       # [NB*HW, Cout]

    # ---- residual add (downsample=None -> identity) + ReLU --------------
    out = jnp.maximum(h3 + x.astype(jnp.float32), 0.0)
    # TODO(synk): forward() references self.dropout which is never built in
    # __init__ (rate 0.0 anyway) -> identity; not materialized here.
    o_ref[...] = out.reshape(NB, HW, Cout).astype(o_ref.dtype)


def _pick_batch_block(N, H, W, Cin, P, Cout, budget_bytes=6 * 1024 * 1024):
    # Largest divisor of N whose per-step activation footprint fits budget.
    per_image = (H * W * (Cin * 2 + Cout * 4 + 9 * P * (2 + 4) + 2 * P * 4)
                 + (H + 2) * (W + 2) * P * 2)
    for nb in range(N, 0, -1):
        if N % nb == 0 and nb * per_image <= budget_bytes:
            return nb
    return 1


def bottleneck_forward_nhwc(x_nhwc, w1_oihw, w2_oihw, w3_oihw,
                            gamma, beta, running_mean, running_var,
                            eps=1e-5, batch_block=None):
    N, H, W, Cin = x_nhwc.shape
    P = w1_oihw.shape[0]
    Cout = w3_oihw.shape[0]
    assert Cout == Cin, "downsample is None, so in/out channels must match"

    NB = batch_block or _pick_batch_block(N, H, W, Cin, P, Cout)
    assert N % NB == 0

    # bf16 operands for the MXU; accumulation / epilogue stay f32.
    x = x_nhwc.reshape(N, H * W, Cin).astype(jnp.bfloat16)
    w1 = jnp.transpose(w1_oihw[:, :, 0, 0], (1, 0)).astype(jnp.bfloat16)       # [Cin, P]
    w2 = jnp.transpose(w2_oihw, (2, 3, 1, 0)).reshape(9 * P, P).astype(jnp.bfloat16)
    scale = gamma / jnp.sqrt(running_var + eps)                                # f32, host-side fold
    w3 = (jnp.transpose(w3_oihw[:, :, 0, 0], (1, 0)) * scale[None, :]).astype(jnp.bfloat16)
    bias = (beta - running_mean * scale).reshape(1, Cout).astype(jnp.float32)

    # Rough per-step VMEM need (double-buffered I/O + scratch + temps).
    rows = NB * H * W
    est = (2 * rows * Cin * 2 + 2 * rows * Cout * 4
           + NB * (H + 2) * (W + 2) * P * 2
           + rows * 9 * P * (2 + 2) + rows * (2 * P + 2 * Cout) * 4
           + 2 * (Cin * P + 9 * P * P + P * Cout) * 2)
    vmem_limit = int(min(48 * 1024 * 1024, max(16 * 1024 * 1024, 2 * est)))

    kernel = functools.partial(_bottleneck_kernel, H, W)
    out_flat = pl.pallas_call(
        kernel,
        out_shape=jax.ShapeDtypeStruct((N, H * W, Cout), x_nhwc.dtype),
        grid_spec=pltpu.PrefetchScalarGridSpec(
            num_scalar_prefetch=0,
            grid=(N // NB,),
            in_specs=[
                pl.BlockSpec((NB, H * W, Cin), lambda n: (n, 0, 0)),
                pl.BlockSpec((Cin, P), lambda n: (0, 0)),
                pl.BlockSpec((9 * P, P), lambda n: (0, 0)),
                pl.BlockSpec((P, Cout), lambda n: (0, 0)),
                pl.BlockSpec((1, Cout), lambda n: (0, 0)),
            ],
            out_specs=pl.BlockSpec((NB, H * W, Cout), lambda n: (n, 0, 0)),
            scratch_shapes=[pltpu.VMEM((NB, H + 2, W + 2, P), jnp.bfloat16)],
        ),
        compiler_params=pltpu.CompilerParams(
            dimension_semantics=("parallel",),
            vmem_limit_bytes=vmem_limit,
        ),
    )(x, w1, w2, w3, bias)
    return out_flat.reshape(N, H, W, Cout)


def bottleneck_forward(x_nchw, w1_oihw, w2_oihw, w3_oihw,
                       gamma, beta, running_mean, running_var, eps=1e-5):
    # NCHW adapter for the PyTorch interface (each transpose is an HBM
    # round trip; keep activations NHWC end-to-end in real deployments).
    x_nhwc = jnp.transpose(x_nchw, (0, 2, 3, 1))
    out = bottleneck_forward_nhwc(x_nhwc, w1_oihw, w2_oihw, w3_oihw,
                                  gamma, beta, running_mean, running_var, eps)
    return jnp.transpose(out, (0, 3, 1, 2))


def _reference(x, w1, w2, w3, gamma, beta, mean, var, eps=1e-5):
    dn = ("NCHW", "OIHW", "NCHW")
    out = lax.conv_general_dilated(x, w1, (1, 1), "VALID", dimension_numbers=dn)
    out = jnp.maximum(out, 0.0)
    out = lax.conv_general_dilated(out, w2, (1, 1), ((1, 1), (1, 1)), dimension_numbers=dn)
    out = jnp.maximum(out, 0.0)
    out = lax.conv_general_dilated(out, w3, (1, 1), "VALID", dimension_numbers=dn)
    scale = gamma / jnp.sqrt(var + eps)
    bias = beta - mean * scale
    out = out * scale[None, :, None, None] + bias[None, :, None, None]
    return jnp.maximum(out + x, 0.0)


if __name__ == "__main__":
    key = jax.random.PRNGKey(0)
    k1, k2, k3, k4, k5, k6, k7, kx = jax.random.split(key, 8)

    # Bottleneck(inplanes=16, planes=4, stride=1, downsample=None)
    N, inplanes, planes, H, W = 2, 16, 4, 8, 8
    Cout = planes * 4  # == inplanes, so the identity residual add is valid

    x = jax.random.normal(kx, (N, inplanes, H, W), jnp.float32)
    w1 = jax.random.normal(k1, (planes, inplanes, 1, 1), jnp.float32) * 0.2
    w2 = jax.random.normal(k2, (planes, planes, 3, 3), jnp.float32) * 0.2
    w3 = jax.random.normal(k3, (Cout, planes, 1, 1), jnp.float32) * 0.2
    gamma = 1.0 + 0.1 * jax.random.normal(k4, (Cout,), jnp.float32)
    beta = 0.1 * jax.random.normal(k5, (Cout,), jnp.float32)
    running_mean = 0.1 * jax.random.normal(k6, (Cout,), jnp.float32)
    running_var = 0.5 + 0.5 * jnp.abs(jax.random.normal(k7, (Cout,), jnp.float32))

    out = bottleneck_forward(x, w1, w2, w3, gamma, beta, running_mean, running_var)
    jax.block_until_ready(out)

    # Reference with bf16-rounded operands (the kernel feeds bf16 operands to
    # the MXU with f32 accumulation), BN math in f32.
    rb = lambda a: a.astype(jnp.bfloat16).astype(jnp.float32)
    ref = _reference(rb(x), rb(w1), rb(w2), rb(w3),
                     gamma, beta, running_mean, running_var)
    max_err = float(jnp.max(jnp.abs(out - ref)))
    assert jnp.allclose(out, ref, atol=3e-2, rtol=3e-2), f"max abs err = {max_err}"
    print("KERNEL_OK")
</pallas_src>

<mosaic_0001>
module attributes {stable_mosaic.version = 11 : i64} {
  func.func @_bottleneck_kernel(%arg0: i32, %arg1: memref<2x64x16xbf16, #tpu.memory_space<vmem>>, %arg2: memref<16x4xbf16, #tpu.memory_space<vmem>>, %arg3: memref<36x4xbf16, #tpu.memory_space<vmem>>, %arg4: memref<4x16xbf16, #tpu.memory_space<vmem>>, %arg5: memref<1x16xf32, #tpu.memory_space<vmem>>, %arg6: memref<2x64x16xf32, #tpu.memory_space<vmem>>, %arg7: memref<2x10x10x4xbf16, #tpu.memory_space<vmem>>) attributes {dimension_semantics = [#tpu.dimension_semantics<parallel>], iteration_bounds = array<i64: 1>, scalar_prefetch = 0 : i64, scratch_operands = 1 : i64, tpu.core_type = #tpu.core_type<tc>, window_params = [{transform_indices = @transform_0, window_bounds = array<i64: 2, 64, 16>}, {pipeline_mode = #tpu.pipeline_mode<synchronous>, transform_indices = @transform_1, window_bounds = array<i64: 16, 4>}, {pipeline_mode = #tpu.pipeline_mode<synchronous>, transform_indices = @transform_2, window_bounds = array<i64: 36, 4>}, {pipeline_mode = #tpu.pipeline_mode<synchronous>, transform_indices = @transform_3, window_bounds = array<i64: 4, 16>}, {pipeline_mode = #tpu.pipeline_mode<synchronous>, transform_indices = @transform_4, window_bounds = array<i64: 1, 16>}, {transform_indices = @transform_5, window_bounds = array<i64: 2, 64, 16>}]} {
    %c0 = arith.constant 0 : index
    %c0_0 = arith.constant 0 : index
    %c0_1 = arith.constant 0 : index
    %0 = vector.load %arg1[%c0, %c0_0, %c0_1] : memref<2x64x16xbf16, #tpu.memory_space<vmem>>, vector<2x64x16xbf16>
    %1 = vector.shape_cast %0 : vector<2x64x16xbf16> to vector<128x16xbf16>
    %c0_2 = arith.constant 0 : index
    %c0_3 = arith.constant 0 : index
    %2 = vector.load %arg2[%c0_2, %c0_3] : memref<16x4xbf16, #tpu.memory_space<vmem>>, vector<16x4xbf16>
    %cst = arith.constant dense<0.000000e+00> : vector<128x4xf32>
    %3 = tpu.matmul %1, %2, %cst {dimension_numbers = #tpu.dot_dimension_numbers<[1], [0], [0], [1], [0, 0, 1, 1], [], []>} : vector<128x16xbf16>, vector<16x4xbf16>, vector<128x4xf32> -> vector<128x4xf32>
    %cst_4 = arith.constant 0.000000e+00 : f32
    %4 = vector.broadcast %cst_4 : f32 to vector<128x4xf32>
    %5 = arith.maximumf %3, %4 : vector<128x4xf32>
    %6 = arith.truncf %5 : vector<128x4xf32> to vector<128x4xbf16>
    %cst_5 = arith.constant 0.000000e+00 : bf16
    %7 = vector.broadcast %cst_5 : bf16 to vector<2x10x10x4xbf16>
    %c0_6 = arith.constant 0 : index
    %c0_7 = arith.constant 0 : index
    %c0_8 = arith.constant 0 : index
    %c0_9 = arith.constant 0 : index
    %8 = vector.load %arg7[%c0_6, %c0_7, %c0_8, %c0_9] : memref<2x10x10x4xbf16, #tpu.memory_space<vmem>>, vector<2x10x10x4xbf16>
    tpu.vector_store %arg7[%c0_6, %c0_7, %c0_8, %c0_9], %7 {strides = array<i32>} : memref<2x10x10x4xbf16, #tpu.memory_space<vmem>>, vector<2x10x10x4xbf16>,
    %9 = vector.shape_cast %6 : vector<128x4xbf16> to vector<2x8x8x4xbf16>
    %c0_10 = arith.constant 0 : index
    %c1 = arith.constant 1 : index
    %c1_11 = arith.constant 1 : index
    %c0_12 = arith.constant 0 : index
    %10 = vector.load %arg7[%c0_10, %c1, %c1_11, %c0_12] : memref<2x10x10x4xbf16, #tpu.memory_space<vmem>>, vector<2x8x8x4xbf16>
    tpu.vector_store %arg7[%c0_10, %c1, %c1_11, %c0_12], %9 {strides = array<i32>} : memref<2x10x10x4xbf16, #tpu.memory_space<vmem>>, vector<2x8x8x4xbf16>,
    %c0_13 = arith.constant 0 : index
    %c0_14 = arith.constant 0 : index
    %c0_15 = arith.constant 0 : index
    %c0_16 = arith.constant 0 : index
    %11 = vector.load %arg7[%c0_13, %c0_14, %c0_15, %c0_16] : memref<2x10x10x4xbf16, #tpu.memory_space<vmem>>, vector<2x8x8x4xbf16>
    %c0_17 = arith.constant 0 : index
    %c0_18 = arith.constant 0 : index
    %c1_19 = arith.constant 1 : index
    %c0_20 = arith.constant 0 : index
    %12 = vector.load %arg7[%c0_17, %c0_18, %c1_19, %c0_20] : memref<2x10x10x4xbf16, #tpu.memory_space<vmem>>, vector<2x8x8x4xbf16>
    %c0_21 = arith.constant 0 : index
    %c0_22 = arith.constant 0 : index
    %c2 = arith.constant 2 : index
    %c0_23 = arith.constant 0 : index
    %13 = vector.load %arg7[%c0_21, %c0_22, %c2, %c0_23] : memref<2x10x10x4xbf16, #tpu.memory_space<vmem>>, vector<2x8x8x4xbf16>
    %c0_24 = arith.constant 0 : index
    %c1_25 = arith.constant 1 : index
    %c0_26 = arith.constant 0 : index
    %c0_27 = arith.constant 0 : index
    %14 = vector.load %arg7[%c0_24, %c1_25, %c0_26, %c0_27] : memref<2x10x10x4xbf16, #tpu.memory_space<vmem>>, vector<2x8x8x4xbf16>
    %c0_28 = arith.constant 0 : index
    %c1_29 = arith.constant 1 : index
    %c1_30 = arith.constant 1 : index
    %c0_31 = arith.constant 0 : index
    %15 = vector.load %arg7[%c0_28, %c1_29, %c1_30, %c0_31] : memref<2x10x10x4xbf16, #tpu.memory_space<vmem>>, vector<2x8x8x4xbf16>
    %c0_32 = arith.constant 0 : index
    %c1_33 = arith.constant 1 : index
    %c2_34 = arith.constant 2 : index
    %c0_35 = arith.constant 0 : index
    %16 = vector.load %arg7[%c0_32, %c1_33, %c2_34, %c0_35] : memref<2x10x10x4xbf16, #tpu.memory_space<vmem>>, vector<2x8x8x4xbf16>
    %c0_36 = arith.constant 0 : index
    %c2_37 = arith.constant 2 : index
    %c0_38 = arith.constant 0 : index
    %c0_39 = arith.constant 0 : index
    %17 = vector.load %arg7[%c0_36, %c2_37, %c0_38, %c0_39] : memref<2x10x10x4xbf16, #tpu.memory_space<vmem>>, vector<2x8x8x4xbf16>
    %c0_40 = arith.constant 0 : index
    %c2_41 = arith.constant 2 : index
    %c1_42 = arith.constant 1 : index
    %c0_43 = arith.constant 0 : index
    %18 = vector.load %arg7[%c0_40, %c2_41, %c1_42, %c0_43] : memref<2x10x10x4xbf16, #tpu.memory_space<vmem>>, vector<2x8x8x4xbf16>
    %c0_44 = arith.constant 0 : index
    %c2_45 = arith.constant 2 : index
    %c2_46 = arith.constant 2 : index
    %c0_47 = arith.constant 0 : index
    %19 = vector.load %arg7[%c0_44, %c2_45, %c2_46, %c0_47] : memref<2x10x10x4xbf16, #tpu.memory_space<vmem>>, vector<2x8x8x4xbf16>
    %20 = tpu.concatenate %11, %12, %13, %14, %15, %16, %17, %18, %19 in 3 : vector<2x8x8x4xbf16>, vector<2x8x8x4xbf16>, vector<2x8x8x4xbf16>, vector<2x8x8x4xbf16>, vector<2x8x8x4xbf16>, vector<2x8x8x4xbf16>, vector<2x8x8x4xbf16>, vector<2x8x8x4xbf16>, vector<2x8x8x4xbf16> -> vector<2x8x8x36xbf16>
    %21 = vector.shape_cast %20 : vector<2x8x8x36xbf16> to vector<128x36xbf16>
    %c0_48 = arith.constant 0 : index
    %c0_49 = arith.constant 0 : index
    %22 = vector.load %arg3[%c0_48, %c0_49] : memref<36x4xbf16, #tpu.memory_space<vmem>>, vector<36x4xbf16>
    %cst_50 = arith.constant dense<0.000000e+00> : vector<128x4xf32>
    %23 = tpu.matmul %21, %22, %cst_50 {dimension_numbers = #tpu.dot_dimension_numbers<[1], [0], [0], [1], [0, 0, 1, 1], [], []>} : vector<128x36xbf16>, vector<36x4xbf16>, vector<128x4xf32> -> vector<128x4xf32>
    %cst_51 = arith.constant 0.000000e+00 : f32
    %24 = vector.broadcast %cst_51 : f32 to vector<128x4xf32>
    %25 = arith.maximumf %23, %24 : vector<128x4xf32>
    %26 = arith.truncf %25 : vector<128x4xf32> to vector<128x4xbf16>
    %c0_52 = arith.constant 0 : index
    %c0_53 = arith.constant 0 : index
    %27 = vector.load %arg4[%c0_52, %c0_53] : memref<4x16xbf16, #tpu.memory_space<vmem>>, vector<4x16xbf16>
    %cst_54 = arith.constant dense<0.000000e+00> : vector<128x16xf32>
    %28 = tpu.matmul %26, %27, %cst_54 {dimension_numbers = #tpu.dot_dimension_numbers<[1], [0], [0], [1], [0, 0, 1, 1], [], []>} : vector<128x4xbf16>, vector<4x16xbf16>, vector<128x16xf32> -> vector<128x16xf32>
    %c0_55 = arith.constant 0 : index
    %c0_56 = arith.constant 0 : index
    %29 = vector.load %arg5[%c0_55, %c0_56] : memref<1x16xf32, #tpu.memory_space<vmem>>, vector<1x16xf32>
    %30 = vector.broadcast %29 : vector<1x16xf32> to vector<128x16xf32>
    %31 = arith.addf %28, %30 : vector<128x16xf32>
    %32 = arith.extf %1 : vector<128x16xbf16> to vector<128x16xf32>
    %33 = arith.addf %31, %32 : vector<128x16xf32>
    %cst_57 = arith.constant 0.000000e+00 : f32
    %34 = vector.broadcast %cst_57 : f32 to vector<128x16xf32>
    %35 = arith.maximumf %33, %34 : vector<128x16xf32>
    %36 = vector.shape_cast %35 : vector<128x16xf32> to vector<2x64x16xf32>
    %c0_58 = arith.constant 0 : index
    %c0_59 = arith.constant 0 : index
    %c0_60 = arith.constant 0 : index
    %37 = vector.load %arg6[%c0_58, %c0_59, %c0_60] : memref<2x64x16xf32, #tpu.memory_space<vmem>>, vector<2x64x16xf32>
    tpu.vector_store %arg6[%c0_58, %c0_59, %c0_60], %36 {strides = array<i32>} : memref<2x64x16xf32, #tpu.memory_space<vmem>>, vector<2x64x16xf32>,
    return
  }
  func.func @transform_0(%arg0: i32) -> (i32, i32, i32) {
    %c0_i32 = arith.constant 0 : i32
    %c0_i32_0 = arith.constant 0 : i32
    %c0_i32_1 = arith.constant 0 : i32
    return %arg0, %c0_i32, %c0_i32_0 : i32, i32, i32
  }
  func.func @transform_1(%arg0: i32) -> (i32, i32) {
    %c0_i32 = arith.constant 0 : i32
    %c0_i32_0 = arith.constant 0 : i32
    %c0_i32_1 = arith.constant 0 : i32
    return %c0_i32, %c0_i32_0 : i32, i32
  }
  func.func @transform_2(%arg0: i32) -> (i32, i32) {
    %c0_i32 = arith.constant 0 : i32
    %c0_i32_0 = arith.constant 0 : i32
    %c0_i32_1 = arith.constant 0 : i32
    return %c0_i32, %c0_i32_0 : i32, i32
  }
  func.func @transform_3(%arg0: i32) -> (i32, i32) {
    %c0_i32 = arith.constant 0 : i32
    %c0_i32_0 = arith.constant 0 : i32
    %c0_i32_1 = arith.constant 0 : i32
    return %c0_i32, %c0_i32_0 : i32, i32
  }
  func.func @transform_4(%arg0: i32) -> (i32, i32) {
    %c0_i32 = arith.constant 0 : i32
    %c0_i32_0 = arith.constant 0 : i32
    %c0_i32_1 = arith.constant 0 : i32
    return %c0_i32, %c0_i32_0 : i32, i32
  }
  func.func @transform_5(%arg0: i32) -> (i32, i32, i32) {
    %c0_i32 = arith.constant 0 : i32
    %c0_i32_0 = arith.constant 0 : i32
    %c0_i32_1 = arith.constant 0 : i32
    return %arg0, %c0_i32, %c0_i32_0 : i32, i32, i32
  }
}

</mosaic_0001>

<bundles_post_ra>
// kernel: tpu_custom_call.1
= control target key start
LH: loop header
LB: loop body
LE: loop exit
PB: predicated region body
PF: predicated region fallthrough
CT: control target
= control target key end

     0   :  { %vm85_vm0 = vcmask 130048   ;;  %vm191_vm1 = vcmask 27648   ;;  %vm193_vm2 = vcmask 24576   ;;  %v2389_v3 = vmov 0   ;;  %s2390_s25 = smov 32   ;;  %s2391_s26 = smov 8   ;;  %s3367_s1 = inlined_call_operand.vmem [shape: bf16[16,4], index: 1, kind: input, shape index: {}]   ;;  %s3368_s0 = inlined_call_operand.vmem [shape: bf16[2,64,16], index: 0, kind: input, shape index: {}]   ;;  %s3369_s2 = inlined_call_operand.vmem [shape: bf16[36,4], index: 2, kind: input, shape index: {}]   ;;  %s3370_s3 = inlined_call_operand.vmem [shape: bf16[4,16], index: 3, kind: input, shape index: {}]   ;;  %s3371_s4 = inlined_call_operand.vmem [shape: f32[1,16], index: 4, kind: input, shape index: {}]   ;;  %s3372_s5 = inlined_call_operand.vmem [shape: f32[2,64,16], index: 5, kind: output, shape index: {}]  }
   0x1   :  { %v2363_v0 = vld [vmem:[%s3367_s1] sm:$0xff]  ;;  %v2362_v2 = vld [vmem:[%s3368_s0 + $0x38] sm:$0xff]  ;;  %211 = vst.msk [vmem:[#allocation2 + $0x48] sm:$0xf] %vm191_vm1, %v2389_v3  ;;  %v2356_v8 = vld [vmem:[%s3368_s0 + $0x8] sm:$0xff]  ;;  %s2392_s6 = smov 4  }
   0x2   :  { %v2355_v1 = vld [vmem:[%s3368_s0] sm:$0xff]  ;;  %117 = vmatpush.bf16.msra.mxu0 %v2363_v0  ;;  %2366 = vmatpush.bf16.msra.mxu3 %v2363_v0  ;;  %212 = vst.msk [vmem:[#allocation2 + $0x4c] sm:$0x1] %vm193_vm2, %v2389_v3  ;;  %v2357_v19 = vld [vmem:[%s3368_s0 + $0x10] sm:$0xff]  ;;  %v2358_v31 = vld [vmem:[%s3368_s0 + $0x18] sm:$0xff]  ;;  %s2393_s7 = smov 28  }
   0x3   :  { %192 = vst.msk [vmem:[#allocation2] sm:$0xf] %vm191_vm1, %v2389_v3  ;;  %s2394_s8 = smov 24   ;;  %v2359_v47 = vld [vmem:[%s3368_s0 + $0x20] sm:$0xff]  ;;  %vm395_vm3 = vsmask.f32 7938 }
   0x4   :  { %194 = vst.msk [vmem:[#allocation2 + $0x4] sm:$0x1] %vm193_vm2, %v2389_v3  ;;  %vm401_vm4 = vsmask.f32 256  ;;  %vm2553_vm5 = vmand %vm191_vm1, %vm395_vm3  ;;  %s2395_s11 = smov 12   ;;  %s2396_s14 = smov 20  }
   0x5   :  { %2323 = vmatmul.msk.bf16.vlgmr.msra.gmra.mxu0 %vm85_vm0, %v2355_v1  ;;  %2330 = vmatmul.msk.bf16.vlgmr.msra.gmra.mxu3 %vm85_vm0, %v2362_v2  ;;  %195 = vst.msk [vmem:[#allocation2 + $0x8] sm:$0xf] %vm191_vm1, %v2389_v3  ;;  %vm2558_vm6 = vmand %vm193_vm2, %vm401_vm4  ;;  %s2397_s15 = smov 16   ;;  %vm1697_vm7 = vcmask 31744   ;;  %vm1746_vm8 = vcmask 64512   ;;  %vm2061_vm9 = vcmask 1041408  }
   0x6   :  { %196 = vst.msk [vmem:[#allocation2 + $0xc] sm:$0x1] %vm193_vm2, %v2389_v3  ;;  %vm1779_vm10 = vcmask 97280   ;;  %vm1844_vm11 = vcmask 162816   ;;  %vm1877_vm12 = vcmask 195584   ;;  %vm1910_vm13 = vcmask 228352  }
   0x7   :  { %197 = vst.msk [vmem:[#allocation2 + $0x10] sm:$0xf] %vm191_vm1, %v2389_v3  ;;  %vm1943_vm14 = vcmask 261120   ;;  %vm2036_vm15 = vcmask 293888  }
   0x8   :  { %v632_v4 = vld [vmem:[#allocation2 + $0x48] sm:$0xe]  ;;  %198 = vst.msk [vmem:[#allocation2 + $0x14] sm:$0x1] %vm193_vm2, %v2389_v3 }
   0x9   :  { %v2455_v5 = vld [vmem:[#allocation2 + $0x4c] sm:$0x1]  ;;  %v1624_v6 = vunpack.c.l.b16 %v632_v4  ;;  %199 = vst.msk [vmem:[#allocation2 + $0x18] sm:$0xf] %vm191_vm1, %v2389_v3  ;;  %v600_v32 = vld [vmem:[#allocation2 + $0x48] sm:$0xf] }
   0xa   :  { %v1432_v7 = vunpack.c.l.b16 %v2455_v5  ;;  %200 = vst.msk [vmem:[#allocation2 + $0x1c] sm:$0x1] %vm193_vm2, %v2389_v3  ;;  %v528_v12 = vld [vmem:[#allocation2] sm:$0xe]  ;;  %v1352_v33 = vunpack.c.l.b16 %v600_v32 }
   0xb   :  { %201 = vst.msk [vmem:[#allocation2 + $0x20] sm:$0xf] %vm191_vm1, %v2389_v3  ;;  %v512_v11 = vld [vmem:[#allocation2 + $0x4] sm:$0x1]  ;;  %v881_v14 = vunpack.c.l.b16 %v528_v12  ;;  %v496_v17 = vld [vmem:[#allocation2] sm:$0xf] }
   0xc   :  { %v1640_v9 = vpack.c.b16 %v1432_v7, %v1624_v6  ;;  %202 = vst.msk [vmem:[#allocation2 + $0x24] sm:$0x1] %vm193_vm2, %v2389_v3  ;;  %v674_v13 = vunpack.c.l.b16 %v512_v11  ;;  %v673_v18 = vunpack.c.l.b16 %v496_v17  ;;  %v1448_v34 = vpack.c.b16 %v1432_v7, %v1352_v33  ;;  %v397_v57 = vld [vmem:[#allocation2 + $0x8] sm:$0xf] }
   0xd   :  { %203 = vst.msk [vmem:[#allocation2 + $0x28] sm:$0xf] %vm191_vm1, %v2389_v3  ;;  %v1368_v46 = vpack.c.b16 %v1352_v33, %v1352_v33  ;;  %v403_v59 = vld [vmem:[#allocation2 + $0xc] sm:$0x1] }
   0xe   :  { %v1656_v10 = vrot.slane %v1640_v9, 1  ;;  %204 = vst.msk [vmem:[#allocation2 + $0x2c] sm:$0x1] %vm193_vm2, %v2389_v3  ;;  %v897_v15 = vpack.c.b16 %v674_v13, %v881_v14  ;;  %v705_v21 = vpack.c.b16 %v674_v13, %v673_v18  ;;  %v1509_v35 = vshll.u32 %v1448_v34, 16 }
   0xf   :  { %205 = vst.msk [vmem:[#allocation2 + $0x30] sm:$0xf] %vm191_vm1, %v2389_v3  ;;  %v1507_v36 = vshrl.u32 %v1448_v34, 16  ;;  %1391 = vrot.lane.b32.xlu2 %v1368_v46, %s2394_s8 }
  0x10   :  { %1679 = vrot.lane.b32.xlu0 %v1656_v10, %s2390_s25  ;;  %206 = vst.msk [vmem:[#allocation2 + $0x34] sm:$0x1] %vm193_vm2, %v2389_v3  ;;  %v913_v16 = vrot.slane %v897_v15, 1  ;;  %v724_v26 = vshll.u32 %v705_v21, 16  ;;  %v722_v28 = vshrl.u32 %v705_v21, 16  ;;  %v1511_v37 = vrot.slane %v1509_v35, 1 }
  0x11   :  { %207 = vst.msk [vmem:[#allocation2 + $0x38] sm:$0xf] %vm191_vm1, %v2389_v3 }
  0x12   :  { %208 = vst.msk [vmem:[#allocation2 + $0x3c] sm:$0x1] %vm193_vm2, %v2389_v3  ;;  %929 = vrot.lane.b32.xlu1 %v913_v16, %s2391_s26  ;;  %v726_v29 = vrot.slane %v724_v26, 1  ;;  %v1512_v38 = vor.u32 %v1511_v37, %v1507_v36 }
  0x13   :  { %209 = vst.msk [vmem:[#allocation2 + $0x40] sm:$0xf] %vm191_vm1, %v2389_v3 }
  0x14   :  { %210 = vst.msk [vmem:[#allocation2 + $0x44] sm:$0x1] %vm193_vm2, %v2389_v3  ;;  %v727_v30 = vor.u32 %v726_v29, %v722_v28 }
  0x15   :  { %2324 = vmatmul.msk.bf16.gmra.mxu0 %vm85_vm0, %v2356_v8  ;;  %213 = vst.msk [vmem:[#allocation2 + $0x50] sm:$0xf] %vm191_vm1, %v2389_v3 }
  0x16   :  { %214 = vst.msk [vmem:[#allocation2 + $0x54] sm:$0x1] %vm193_vm2, %v2389_v3 }
  0x17   :  { %215 = vst.msk [vmem:[#allocation2 + $0x58] sm:$0xf] %vm191_vm1, %v2389_v3 }
  0x18   :  { %216 = vst.msk [vmem:[#allocation2 + $0x5c] sm:$0x1] %vm193_vm2, %v2389_v3 }
  0x19   :  { %217 = vst.msk [vmem:[#allocation2 + $0x60] sm:$0xf] %vm191_vm1, %v2389_v3 }
  0x1a   :  { %218 = vst.msk [vmem:[#allocation2 + $0x64] sm:$0x1] %vm193_vm2, %v2389_v3  ;;  %1583 = vrot.lane.b32.xlu1 %v1512_v38, %s2393_s7 }
  0x1b   :  { %219 = vst.msk [vmem:[#allocation2 + $0x68] sm:$0xf] %vm191_vm1, %v2389_v3 }
  0x1c   :  { %220 = vst.msk [vmem:[#allocation2 + $0x6c] sm:$0x1] %vm193_vm2, %v2389_v3  ;;  %v536_v20 = vld [vmem:[#allocation2 + $0x50] sm:$0xe] }
  0x1d   :  { %221 = vst.msk [vmem:[#allocation2 + $0x70] sm:$0xf] %vm191_vm1, %v2389_v3  ;;  %v520_v22 = vld [vmem:[#allocation2 + $0x54] sm:$0x1]  ;;  %v889_v23 = vunpack.c.l.b16 %v536_v20  ;;  %v2542_v39 = vld [vmem:[#allocation2 + $0x50] sm:$0xf] }
  0x1e   :  { %222 = vst.msk [vmem:[#allocation2 + $0x74] sm:$0x1] %vm193_vm2, %v2389_v3  ;;  %v690_v24 = vunpack.c.l.b16 %v520_v22  ;;  %v689_v40 = vunpack.c.l.b16 %v2542_v39  ;;  %v409_v20 = vld [vmem:[#allocation2 + $0x14] sm:$0x1] }
  0x1f   :  { %223 = vst.msk [vmem:[#allocation2 + $0x78] sm:$0xf] %vm191_vm1, %v2389_v3 }
  0x20   :  { %224 = vst.msk [vmem:[#allocation2 + $0x7c] sm:$0x1] %vm193_vm2, %v2389_v3  ;;  %v905_v25 = vpack.c.b16 %v690_v24, %v889_v23  ;;  %v713_v41 = vpack.c.b16 %v690_v24, %v689_v40 }
  0x21   :  { %225 = vst.msk [vmem:[#allocation2 + $0x80] sm:$0xf] %vm191_vm1, %v2389_v3 }
  0x22   :  { %226 = vst.msk [vmem:[#allocation2 + $0x84] sm:$0x1] %vm193_vm2, %v2389_v3  ;;  %v921_v27 = vrot.slane %v905_v25, 1  ;;  %v780_v42 = vshll.u32 %v713_v41, 16  ;;  %v778_v43 = vshrl.u32 %v713_v41, 16 }
  0x23   :  { %227 = vst.msk [vmem:[#allocation2 + $0x88] sm:$0xf] %vm191_vm1, %v2389_v3 }
  0x24   :  { %228 = vst.msk [vmem:[#allocation2 + $0x8c] sm:$0x1] %vm193_vm2, %v2389_v3  ;;  %945 = vrot.lane.b32.xlu0 %v921_v27, %s2391_s26  ;;  %v782_v44 = vrot.slane %v780_v42, 1 }
  0x25   :  { %2325 = vmatmul.msk.bf16.gmra.mxu0 %vm85_vm0, %v2357_v19  ;;  %229 = vst.msk [vmem:[#allocation2 + $0x90] sm:$0xf] %vm191_vm1, %v2389_v3  ;;  %v406_v19 = vld [vmem:[#allocation2 + $0x10] sm:$0xf] }
  0x26   :  { %230 = vst.msk [vmem:[#allocation2 + $0x94] sm:$0x1] %vm193_vm2, %v2389_v3  ;;  %v783_v45 = vor.u32 %v782_v44, %v778_v43 }
  0x27   :  { %231 = vst.msk [vmem:[#allocation2 + $0x98] sm:$0xf] %vm191_vm1, %v2389_v3 }
  0x28   :  { %232 = vst.msk [vmem:[#allocation2 + $0x9c] sm:$0x1] %vm193_vm2, %v2389_v3  ;;  %849 = vrot.lane.b32.xlu1 %v783_v45, %s2392_s6 }
  0x2a   :  { %v484_v7 = vld [vmem:[#allocation2 + $0x88] sm:$0xf] }
  0x2b   :  { %v487_v8 = vld [vmem:[#allocation2 + $0x8c] sm:$0x1] }
  0x2c   :  { %833 = vrot.lane.b32.xlu0 %v727_v30, %s2392_s6 }
  0x2d   :  { %v493_v32 = vld [vmem:[#allocation2 + $0x94] sm:$0x1] }
  0x35   :  { %2326 = vmatmul.msk.bf16.gmra.mxu0 %vm85_vm0, %v2358_v31  ;;  %v490_v31 = vld [vmem:[#allocation2 + $0x90] sm:$0xf] }
  0x45   :  { %2327 = vmatmul.msk.bf16.gmra.mxu0 %vm85_vm0, %v2359_v47 }
  0x82   :  { %v119_v48 = vpop.f32.mrf.mxu0 }
  0x83   :  { %v159_v49 = vmax.f32 %v119_v48, 0.0 }
  0x85   :  { %v175_v50 = vpack.c.bf16 %v159_v49, %v159_v49 }
  0x87   :  { %v234_v51 = vshrl.u32 %v175_v50, 16  ;;  %v237_v54 = vshll.u32 %v175_v50, 16 }
  0x88   :  { %v154_v52 = vpop.f32.mrf.mxu3 }
  0x89   :  { %v236_v53 = vrot.slane %v234_v51, 7  ;;  %v173_v56 = vmax.f32 %v154_v52, 0.0 }
  0x8a   :  { %v121_v60 = vpop.f32.mrf.mxu0 }
  0x8b   :  { %v239_v61 = vor.u32 %v237_v54, %v236_v53  ;;  %v240_v62 = vrot.slane %v236_v53, 4  ;;  %v189_v63 = vpack.c.bf16 %v173_v56, %v173_v56  ;;  %v160_v0 = vmax.f32 %v121_v60, 0.0  ;;  %v412_v54 = vld [vmem:[#allocation2 + $0x18] sm:$0xf] }
  0x8d   :  { %v398_v1 = vsel %vm2553_vm5, %v239_v61, %v397_v57  ;;  %v404_v2 = vsel %vm2558_vm6, %v240_v62, %v403_v59  ;;  %v346_v3 = vshrl.u32 %v189_v63, 16  ;;  %v349_v4 = vshll.u32 %v189_v63, 16  ;;  %v415_v61 = vld [vmem:[#allocation2 + $0x1c] sm:$0x1] }
  0x8e   :  { %399 = vst [vmem:[#allocation2 + $0x8] sm:$0xf] %v398_v1  ;;  %v176_v5 = vpack.c.bf16 %v160_v0, %v160_v0 }
  0x8f   :  { %405 = vst [vmem:[#allocation2 + $0xc] sm:$0x1] %v404_v2  ;;  %v348_v6 = vrot.slane %v346_v3, 7 }
  0x90   :  { %v242_v9 = vshrl.u32 %v176_v5, 16  ;;  %v156_v10 = vpop.f32.mrf.mxu3  ;;  %v245_v15 = vshll.u32 %v176_v5, 16 }
  0x91   :  { %v351_v11 = vor.u32 %v349_v4, %v348_v6  ;;  %v352_v12 = vrot.slane %v348_v6, 4  ;;  %v174_v13 = vmax.f32 %v156_v10, 0.0  ;;  %v2360_v6 = vld [vmem:[%s3368_s0 + $0x28] sm:$0xff] }
  0x92   :  { %v244_v14 = vrot.slane %v242_v9, 7  ;;  %v124_v16 = vpop.f32.mrf.mxu0  ;;  %2328 = vmatmul.msk.bf16.gmra.mxu0 %vm85_vm0, %v2360_v6 }
  0x93   :  { %v485_v17 = vsel %vm2553_vm5, %v351_v11, %v484_v7  ;;  %v488_v18 = vsel %vm2558_vm6, %v352_v12, %v487_v8  ;;  %v190_v21 = vpack.c.bf16 %v174_v13, %v174_v13  ;;  %v161_v22 = vmax.f32 %v124_v16, 0.0 }
  0x94   :  { %486 = vst [vmem:[#allocation2 + $0x88] sm:$0xf] %v485_v17  ;;  %v247_v23 = vor.u32 %v245_v15, %v244_v14  ;;  %v248_v24 = vrot.slane %v244_v14, 4 }
  0x95   :  { %489 = vst [vmem:[#allocation2 + $0x8c] sm:$0x1] %v488_v18  ;;  %v354_v25 = vshrl.u32 %v190_v21, 16  ;;  %v357_v26 = vshll.u32 %v190_v21, 16  ;;  %v544_v27 = vld [vmem:[#allocation2 + $0x8] sm:$0xf]  ;;  %v177_v28 = vpack.c.bf16 %v161_v22, %v161_v22 }
  0x96   :  { %v407_v29 = vsel %vm2553_vm5, %v247_v23, %v406_v19  ;;  %v410_v30 = vsel %vm2558_vm6, %v248_v24, %v409_v20  ;;  %v977_v33 = vunpack.c.l.b16 %v544_v27  ;;  %v513_v34 = vld [vmem:[#allocation2 + $0xc] sm:$0x1]  ;;  %v529_v35 = vld [vmem:[#allocation2 + $0x8] sm:$0xe]  ;;  %v418_v20 = vld [vmem:[#allocation2 + $0x20] sm:$0xf] }
  0x97   :  { %v497_v36 = vld [vmem:[#allocation2 + $0x8] sm:$0xf]  ;;  %408 = vst [vmem:[#allocation2 + $0x10] sm:$0xf] %v407_v29  ;;  %v356_v37 = vrot.slane %v354_v25, 7  ;;  %v676_v38 = vunpack.c.l.b16 %v513_v34  ;;  %v882_v40 = vunpack.c.l.b16 %v529_v35  ;;  %v250_v46 = vshrl.u32 %v177_v28, 16 }
  0x98   :  { %v675_v41 = vunpack.c.l.b16 %v497_v36  ;;  %v560_v42 = vld [vmem:[#allocation2 + $0xc] sm:$0x1]  ;;  %411 = vst [vmem:[#allocation2 + $0x14] sm:$0x1] %v410_v30  ;;  %v993_v43 = vpack.c.b16 %v977_v33, %v977_v33  ;;  %v576_v44 = vld [vmem:[#allocation2 + $0x8] sm:$0xe] }
  0x99   :  { %v1057_v45 = vunpack.c.l.b16 %v560_v42  ;;  %v253_v47 = vshll.u32 %v177_v28, 16  ;;  %v359_v48 = vor.u32 %v357_v26, %v356_v37  ;;  %v360_v49 = vrot.slane %v356_v37, 4  ;;  %v421_v27 = vld [vmem:[#allocation2 + $0x24] sm:$0x1] }
  0x9a   :  { %v898_v50 = vpack.c.b16 %v676_v38, %v882_v40  ;;  %v706_v51 = vpack.c.b16 %v676_v38, %v675_v41  ;;  %1009 = vrot.lane.b32.xlu2 %v993_v43, %s2395_s11  ;;  %v1249_v52 = vunpack.c.l.b16 %v576_v44  ;;  %v252_v53 = vrot.slane %v250_v46, 7  ;;  %v126_v56 = vpop.f32.mrf.mxu0 }
  0x9b   :  { %v491_v57 = vsel %vm2553_vm5, %v359_v48, %v490_v31  ;;  %v494_v59 = vsel %vm2558_vm6, %v360_v49, %v493_v32  ;;  %v606_v62 = vld [vmem:[#allocation2 + $0x88] sm:$0xf]  ;;  %v1073_v63 = vpack.c.b16 %v1057_v45, %v977_v33  ;;  %v162_v5 = vmax.f32 %v126_v56, 0.0 }
  0x9c   :  { %v914_v60 = vrot.slane %v898_v50, 1  ;;  %492 = vst [vmem:[#allocation2 + $0x90] sm:$0xf] %v491_v57  ;;  %v731_v0 = vshll.u32 %v706_v51, 16  ;;  %v1265_v1 = vpack.c.b16 %v1057_v45, %v1249_v52  ;;  %v255_v2 = vor.u32 %v253_v47, %v252_v53  ;;  %v622_v24 = vld [vmem:[#allocation2 + $0x8c] sm:$0x1] }
  0x9d   :  { %v256_v3 = vrot.slane %v252_v53, 4  ;;  %495 = vst [vmem:[#allocation2 + $0x94] sm:$0x1] %v494_v59  ;;  %v1358_v4 = vunpack.c.l.b16 %v606_v62  ;;  %v729_v7 = vshrl.u32 %v706_v51, 16  ;;  %v1092_v12 = vshll.u32 %v1073_v63, 16 }
  0x9e   :  { %931 = vrot.lane.b32.xlu1 %v914_v60, %s2391_s26  ;;  %v733_v8 = vrot.slane %v731_v0, 1  ;;  %v413_v9 = vsel %vm2553_vm5, %v255_v2, %v412_v54  ;;  %v1281_v11 = vrot.slane %v1265_v1, 1  ;;  %v178_v13 = vpack.c.bf16 %v162_v5, %v162_v5  ;;  %v545_v15 = vld [vmem:[#allocation2 + $0x10] sm:$0xf]  ;;  %v638_v28 = vld [vmem:[#allocation2 + $0x88] sm:$0xe] }
  0x9f   :  { %v416_v10 = vsel %vm2558_vm6, %v256_v3, %v415_v61  ;;  %414 = vst [vmem:[#allocation2 + $0x18] sm:$0xf] %v413_v9  ;;  %v2588_v16 = vld [vmem:[#allocation2 + $0x14] sm:$0x1]  ;;  %v1374_v17 = vpack.c.b16 %v1358_v4, %v1358_v4  ;;  %v978_v21 = vunpack.c.l.b16 %v545_v15  ;;  %v593_v23 = vld [vmem:[#allocation2 + $0x10] sm:$0xf]  ;;  %v1438_v35 = vunpack.c.l.b16 %v622_v24 }
  0xa0   :  { %v734_v14 = vor.u32 %v733_v8, %v729_v7  ;;  %417 = vst [vmem:[#allocation2 + $0x1c] sm:$0x1] %v416_v10  ;;  %v258_v18 = vshrl.u32 %v178_v13, 16  ;;  %v261_v19 = vshll.u32 %v178_v13, 16  ;;  %v1058_v25 = vunpack.c.l.b16 %v2588_v16  ;;  %v2594_v31 = vld [vmem:[#allocation2 + $0x14] sm:$0x1] }
  0xa1   :  { %v1094_v26 = vrot.slane %v1092_v12, 1  ;;  %v625_v32 = vld [vmem:[#allocation2 + $0x10] sm:$0xe]  ;;  %v1090_v33 = vshrl.u32 %v1073_v63, 16  ;;  %v2596_v34 = vunpack.c.l.b16 %v593_v23  ;;  %v1630_v38 = vunpack.c.l.b16 %v638_v28  ;;  %v2603_v46 = vld [vmem:[#allocation2 + $0x14] sm:$0x1] }
  0xa2   :  { %835 = vrot.lane.b32.xlu0 %v734_v14, %s2392_s6  ;;  %1297 = vrot.lane.b32.xlu2 %v1281_v11, %s2396_s14  ;;  %v260_v22 = vrot.slane %v258_v18, 7  ;;  %v1074_v40 = vpack.c.b16 %v1058_v25, %v978_v21  ;;  %v994_v42 = vpack.c.b16 %v978_v21, %v978_v21  ;;  %v1425_v43 = vunpack.c.l.b16 %v2594_v31  ;;  %v498_v45 = vld [vmem:[#allocation2 + $0x10] sm:$0xf]  ;;  %v129_v56 = vpop.f32.mrf.mxu0  ;;  %v424_v12 = vld [vmem:[#allocation2 + $0x28] sm:$0xf] }
  0xa3   :  { %v1095_v41 = vor.u32 %v1094_v26, %v1090_v33  ;;  %v1617_v44 = vunpack.c.l.b16 %v625_v32  ;;  %v1361_v47 = vpack.c.b16 %v2596_v34, %v2596_v34  ;;  %v677_v49 = vunpack.c.l.b16 %v498_v45  ;;  %v577_v53 = vld [vmem:[#allocation2 + $0x10] sm:$0xe]  ;;  %v427_v13 = vld [vmem:[#allocation2 + $0x2c] sm:$0x1] }
  0xa4   :  { %v263_v29 = vor.u32 %v261_v19, %v260_v22  ;;  %v264_v30 = vrot.slane %v260_v22, 4  ;;  %v1099_v48 = vshll.u32 %v1074_v40, 16  ;;  %v678_v50 = vunpack.c.l.b16 %v2603_v46  ;;  %v530_v10 = vld [vmem:[#allocation2 + $0x10] sm:$0xe] }
  0xa5   :  { %v1646_v51 = vpack.c.b16 %v1438_v35, %v1630_v38  ;;  %v1633_v52 = vpack.c.b16 %v1425_v43, %v1617_v44  ;;  %v1454_v54 = vpack.c.b16 %v1438_v35, %v1358_v4  ;;  %v163_v57 = vmax.f32 %v129_v56, 0.0  ;;  %v2361_v15 = vld [vmem:[%s3368_s0 + $0x30] sm:$0xff] }
  0xa6   :  { %1403 = vrot.lane.b32.xlu1 %v1374_v17, %s2394_s8  ;;  %v419_v36 = vsel %vm2553_vm5, %v263_v29, %v418_v20  ;;  %v422_v37 = vsel %vm2558_vm6, %v264_v30, %v421_v27  ;;  %v1101_v59 = vrot.slane %v1099_v48, 1  ;;  %v1250_v60 = vunpack.c.l.b16 %v577_v53  ;;  %v531_v17 = vld [vmem:[#allocation2 + $0x18] sm:$0xe]  ;;  %2329 = vmatmul.msk.bf16.gmra.mxu0 %vm85_vm0, %v2361_v15  ;;  %v433_v48 = vld [vmem:[#allocation2 + $0x34] sm:$0x1] }
  0xa7   :  { %420 = vst [vmem:[#allocation2 + $0x20] sm:$0xf] %v419_v36  ;;  %v707_v61 = vpack.c.b16 %v678_v50, %v677_v49  ;;  %v1662_v62 = vrot.slane %v1646_v51, 1  ;;  %v1649_v63 = vrot.slane %v1633_v52, 1  ;;  %v1551_v0 = vshll.u32 %v1454_v54, 16 }
  0xa8   :  { %423 = vst [vmem:[#allocation2 + $0x24] sm:$0x1] %v422_v37  ;;  %v179_v1 = vpack.c.bf16 %v163_v57, %v163_v57  ;;  %v1097_v2 = vshrl.u32 %v1074_v40, 16  ;;  %v1266_v4 = vpack.c.b16 %v1058_v25, %v1250_v60  ;;  %v1549_v8 = vshrl.u32 %v1454_v54, 16  ;;  %v515_v16 = vld [vmem:[#allocation2 + $0x1c] sm:$0x1] }
  0xa9   :  { %v738_v7 = vshll.u32 %v707_v61, 16  ;;  %v1553_v9 = vrot.slane %v1551_v0, 1  ;;  %v883_v23 = vunpack.c.l.b16 %v530_v10  ;;  %v594_v24 = vld [vmem:[#allocation2 + $0x18] sm:$0xf]  ;;  %v610_v26 = vld [vmem:[#allocation2 + $0x1c] sm:$0x1]  ;;  %v680_v32 = vunpack.c.l.b16 %v515_v16 }
  0xaa   :  { %1201 = vrot.lane.b32.xlu0 %v1095_v41, %s2397_s15  ;;  %1011 = vrot.lane.b32.xlu2 %v994_v42, %s2395_s11  ;;  %v266_v3 = vshrl.u32 %v179_v1, 16  ;;  %v269_v5 = vshll.u32 %v179_v1, 16  ;;  %v1102_v6 = vor.u32 %v1101_v59, %v1097_v2  ;;  %v131_v14 = vpop.f32.mrf.mxu0  ;;  %v1282_v21 = vrot.slane %v1266_v4, 1  ;;  %v499_v46 = vld [vmem:[#allocation2 + $0x18] sm:$0xf] }
  0xab   :  { %v164_v20 = vmax.f32 %v131_v14, 0.0  ;;  %v740_v22 = vrot.slane %v738_v7, 1  ;;  %v1554_v25 = vor.u32 %v1553_v9, %v1549_v8  ;;  %v736_v30 = vshrl.u32 %v707_v61, 16  ;;  %v546_v57 = vld [vmem:[#allocation2 + $0x18] sm:$0xf] }
  0xac   :  { %v268_v11 = vrot.slane %v266_v3, 7  ;;  %v884_v33 = vunpack.c.l.b16 %v531_v17  ;;  %v1346_v35 = vunpack.c.l.b16 %v594_v24  ;;  %v1441_v40 = vpack.c.b16 %v1425_v43, %v2596_v34  ;;  %v562_v60 = vld [vmem:[#allocation2 + $0x1c] sm:$0x1]  ;;  %v626_v1 = vld [vmem:[#allocation2 + $0x18] sm:$0xe] }
  0xad   :  { %v180_v29 = vpack.c.bf16 %v164_v20, %v164_v20  ;;  %v741_v38 = vor.u32 %v740_v22, %v736_v30  ;;  %v1426_v41 = vunpack.c.l.b16 %v610_v26  ;;  %v899_v42 = vpack.c.b16 %v678_v50, %v883_v23  ;;  %v578_v15 = vld [vmem:[#allocation2 + $0x18] sm:$0xe] }
  0xae   :  { %1377 = vrot.lane.b32.xlu1 %v1361_v47, %s2394_s8  ;;  %v271_v18 = vor.u32 %v269_v5, %v268_v11  ;;  %v272_v19 = vrot.slane %v268_v11, 4  ;;  %v900_v45 = vpack.c.b16 %v680_v32, %v884_v33  ;;  %v430_v47 = vld [vmem:[#allocation2 + $0x30] sm:$0xf]  ;;  %v1362_v49 = vpack.c.b16 %v1346_v35, %v1346_v35  ;;  %v547_v17 = vld [vmem:[#allocation2 + $0x20] sm:$0xf] }
  0xaf   :  { %v274_v36 = vshrl.u32 %v180_v29, 16  ;;  %v277_v37 = vshll.u32 %v180_v29, 16  ;;  %v1460_v53 = vshll.u32 %v1441_v40, 16  ;;  %v1442_v54 = vpack.c.b16 %v1426_v41, %v1346_v35  ;;  %v563_v16 = vld [vmem:[#allocation2 + $0x24] sm:$0x1]  ;;  %v2644_v35 = vpop.permute.xlu1 %929 }
  0xb0   :  { %v425_v27 = vsel %vm2553_vm5, %v271_v18, %v424_v12  ;;  %v428_v28 = vsel %vm2558_vm6, %v272_v19, %v427_v13  ;;  %v915_v56 = vrot.slane %v899_v42, 1  ;;  %v679_v59 = vunpack.c.l.b16 %v499_v46  ;;  %v579_v23 = vld [vmem:[#allocation2 + $0x20] sm:$0xe] }
  0xb1   :  { %426 = vst [vmem:[#allocation2 + $0x28] sm:$0xf] %v425_v27  ;;  %v276_v44 = vrot.slane %v274_v36, 7  ;;  %v916_v43 = vrot.slane %v900_v45, 1  ;;  %v979_v50 = vunpack.c.l.b16 %v546_v57  ;;  %v1467_v61 = vshll.u32 %v1442_v54, 16 }
  0xb2   :  { %1691 = vrot.lane.b32.xlu0 %v1662_v62, %s2390_s25  ;;  %1665 = vrot.lane.b32.xlu2 %v1649_v63, %s2390_s25  ;;  %429 = vst [vmem:[#allocation2 + $0x2c] sm:$0x1] %v428_v28  ;;  %v1059_v62 = vunpack.c.l.b16 %v562_v60  ;;  %v1462_v63 = vrot.slane %v1460_v53, 1  ;;  %v708_v0 = vpack.c.b16 %v680_v32, %v679_v59  ;;  %v1458_v2 = vshrl.u32 %v1441_v40, 16  ;;  %v595_v27 = vld [vmem:[#allocation2 + $0x20] sm:$0xf]  ;;  %v134_v36 = vpop.f32.mrf.mxu0 }
  0xb3   :  { %v279_v51 = vor.u32 %v277_v37, %v276_v44  ;;  %v280_v52 = vrot.slane %v276_v44, 4  ;;  %v1465_v3 = vshrl.u32 %v1442_v54, 16  ;;  %v1469_v5 = vrot.slane %v1467_v61, 1  ;;  %v516_v32 = vld [vmem:[#allocation2 + $0x24] sm:$0x1] }
  0xb4   :  { %v1463_v4 = vor.u32 %v1462_v63, %v1458_v2  ;;  %v995_v7 = vpack.c.b16 %v979_v50, %v979_v50  ;;  %v1618_v8 = vunpack.c.l.b16 %v626_v1  ;;  %v745_v9 = vshll.u32 %v708_v0, 16  ;;  %v2642_v33 = vld [vmem:[#allocation2 + $0x20] sm:$0xf] }
  0xb5   :  { %v431_v31 = vsel %vm2553_vm5, %v279_v51, %v430_v47  ;;  %v434_v34 = vsel %vm2558_vm6, %v280_v52, %v433_v48  ;;  %v1470_v10 = vor.u32 %v1469_v5, %v1465_v3  ;;  %v743_v13 = vshrl.u32 %v708_v0, 16  ;;  %v611_v48 = vld [vmem:[#allocation2 + $0x24] sm:$0x1] }
  0xb6   :  { %1203 = vrot.lane.b32.xlu1 %v1102_v6, %s2397_s15  ;;  %432 = vst [vmem:[#allocation2 + $0x30] sm:$0xf] %v431_v31  ;;  %v1075_v6 = vpack.c.b16 %v1059_v62, %v979_v50  ;;  %v1634_v12 = vpack.c.b16 %v1426_v41, %v1618_v8  ;;  %v747_v14 = vrot.slane %v745_v9, 1  ;;  %v1251_v20 = vunpack.c.l.b16 %v578_v15  ;;  %v532_v41 = vld [vmem:[#allocation2 + $0x20] sm:$0xe] }
  0xb7   :  { %435 = vst [vmem:[#allocation2 + $0x34] sm:$0x1] %v434_v34  ;;  %v1060_v24 = vunpack.c.l.b16 %v563_v16  ;;  %v1252_v28 = vunpack.c.l.b16 %v579_v23  ;;  %v1347_v37 = vunpack.c.l.b16 %v595_v27  ;;  %v682_v42 = vunpack.c.l.b16 %v516_v32  ;;  %v627_v31 = vld [vmem:[#allocation2 + $0x20] sm:$0xe]  ;;  %v439_v50 = vld [vmem:[#allocation2 + $0x3c] sm:$0x1]  ;;  %v2651_v1 = vpop.permute.xlu1 %1583 }
  0xb8   :  { %v1106_v11 = vshll.u32 %v1075_v6, 16  ;;  %v1104_v18 = vshrl.u32 %v1075_v6, 16  ;;  %v748_v22 = vor.u32 %v747_v14, %v743_v13  ;;  %v1267_v29 = vpack.c.b16 %v1059_v62, %v1251_v20  ;;  %v2659_v14 = vpop.permute.xlu0 %1679  ;;  %v533_v20 = vld [vmem:[#allocation2 + $0x28] sm:$0xe]  ;;  %v442_v23 = vld [vmem:[#allocation2 + $0x40] sm:$0xf] }
  0xb9   :  { %v1268_v40 = vpack.c.b16 %v1060_v24, %v1252_v28  ;;  %v681_v44 = vunpack.c.l.b16 %v2642_v33  ;;  %v1363_v46 = vpack.c.b16 %v1347_v37, %v1347_v37  ;;  %v885_v51 = vunpack.c.l.b16 %v532_v41 }
  0xba   :  { %1299 = vrot.lane.b32.xlu0 %v1282_v21, %s2396_s14  ;;  %1595 = vrot.lane.b32.xlu2 %v1554_v25, %s2393_s7  ;;  %v1108_v19 = vrot.slane %v1106_v11, 1  ;;  %v1650_v21 = vrot.slane %v1634_v12, 1  ;;  %v980_v25 = vunpack.c.l.b16 %v547_v17  ;;  %v1283_v45 = vrot.slane %v1267_v29, 1  ;;  %v136_v61 = vpop.f32.mrf.mxu0 }
  0xbb   :  { %v1284_v54 = vrot.slane %v1268_v40, 1  ;;  %v709_v57 = vpack.c.b16 %v682_v42, %v681_v44  ;;  %v901_v62 = vpack.c.b16 %v682_v42, %v885_v51  ;;  %v166_v2 = vmax.f32 %v136_v61, 0.0  ;;  %v580_v61 = vld [vmem:[#allocation2 + $0x28] sm:$0xe] }
  0xbc   :  { %v1109_v26 = vor.u32 %v1108_v19, %v1104_v18  ;;  %v1076_v30 = vpack.c.b16 %v1060_v24, %v980_v25  ;;  %v996_v3 = vpack.c.b16 %v980_v25, %v980_v25  ;;  %v1619_v5 = vunpack.c.l.b16 %v627_v31  ;;  %v596_v19 = vld [vmem:[#allocation2 + $0x28] sm:$0xf]  ;;  %v445_v24 = vld [vmem:[#allocation2 + $0x44] sm:$0x1] }
  0xbd   :  { %v752_v6 = vshll.u32 %v709_v57, 16  ;;  %v917_v11 = vrot.slane %v901_v62, 1  ;;  %v750_v16 = vshrl.u32 %v709_v57, 16  ;;  %v1348_v32 = vunpack.c.l.b16 %v596_v19  ;;  %v501_v57 = vld [vmem:[#allocation2 + $0x28] sm:$0xf] }
  0xbe   :  { %837 = vrot.lane.b32.xlu1 %v741_v38, %s2392_s6  ;;  %v165_v38 = vmax.f32 %v134_v36, 0.0  ;;  %v1113_v47 = vshll.u32 %v1076_v30, 16  ;;  %v1111_v59 = vshrl.u32 %v1076_v30, 16  ;;  %v517_v36 = vld [vmem:[#allocation2 + $0x2c] sm:$0x1] }
  0xbf   :  { %v754_v17 = vrot.slane %v752_v6, 1  ;;  %v850_v44 = vpop.permute.xlu1 %849 }
  0xc0   :  { %v1115_v60 = vrot.slane %v1113_v47, 1 }
  0xc1   :  { %v755_v29 = vor.u32 %v754_v17, %v750_v16 }
  0xc2   :  { %933 = vrot.lane.b32.xlu0 %v915_v56, %s2391_s26  ;;  %1379 = vrot.lane.b32.xlu2 %v1362_v49, %s2394_s8  ;;  %v181_v49 = vpack.c.bf16 %v165_v38, %v165_v38  ;;  %v1427_v56 = vunpack.c.l.b16 %v611_v48  ;;  %v628_v38 = vld [vmem:[#allocation2 + $0x28] sm:$0xe] }
  0xc3   :  { %v1620_v48 = vunpack.c.l.b16 %v628_v38 }
  0xc4   :  { %v282_v52 = vshrl.u32 %v181_v49, 16  ;;  %v285_v53 = vshll.u32 %v181_v49, 16  ;;  %v1635_v15 = vpack.c.b16 %v1427_v56, %v1619_v5  ;;  %v1724_v49 = vsel %vm1697_vm7, %v2542_v39, %v850_v44 }
  0xc5   :  { %v683_v39 = vunpack.c.l.b16 %v501_v57  ;;  %v451_v57 = vld [vmem:[#allocation2 + $0x5c] sm:$0x1] }
  0xc6   :  { %935 = vrot.lane.b32.xlu1 %v916_v43, %s2391_s26  ;;  %v284_v34 = vrot.slane %v282_v52, 7  ;;  %v436_v43 = vld [vmem:[#allocation2 + $0x38] sm:$0xf]  ;;  %v1651_v28 = vrot.slane %v1635_v15, 1  ;;  %v548_v52 = vld [vmem:[#allocation2 + $0x28] sm:$0xf] }
  0xc7   :  { %v581_v15 = vld [vmem:[#allocation2 + $0x30] sm:$0xe] }
  0xc8   :  { %v287_v63 = vor.u32 %v285_v53, %v284_v34  ;;  %v288_v0 = vrot.slane %v284_v34, 4  ;;  %v981_v34 = vunpack.c.l.b16 %v548_v52 }
  0xca   :  { %1569 = vrot.lane.b32.xlu0 %v1463_v4, %s2393_s7  ;;  %1013 = vrot.lane.b32.xlu2 %v995_v7, %s2395_s11  ;;  %v1443_v4 = vpack.c.b16 %v1427_v56, %v1347_v37  ;;  %v1116_v7 = vor.u32 %v1115_v60, %v1111_v59  ;;  %v437_v8 = vsel %vm2553_vm5, %v287_v63, %v436_v43  ;;  %v886_v37 = vunpack.c.l.b16 %v533_v20  ;;  %v564_v56 = vld [vmem:[#allocation2 + $0x2c] sm:$0x1] }
  0xcb   :  { %v440_v9 = vsel %vm2558_vm6, %v288_v0, %v439_v50  ;;  %438 = vst [vmem:[#allocation2 + $0x38] sm:$0xf] %v437_v8  ;;  %v1364_v60 = vpack.c.b16 %v1348_v32, %v1348_v32  ;;  %v1061_v62 = vunpack.c.l.b16 %v564_v56  ;;  %v1253_v0 = vunpack.c.l.b16 %v580_v61  ;;  %v448_v56 = vld [vmem:[#allocation2 + $0x58] sm:$0xf] }
  0xcc   :  { %441 = vst [vmem:[#allocation2 + $0x3c] sm:$0x1] %v440_v9  ;;  %v1474_v18 = vshll.u32 %v1443_v4, 16  ;;  %v1472_v25 = vshrl.u32 %v1443_v4, 16  ;;  %v997_v8 = vpack.c.b16 %v981_v34, %v981_v34 }
  0xcd   :  { %v1077_v4 = vpack.c.b16 %v1061_v62, %v981_v34 }
  0xce   :  { %1571 = vrot.lane.b32.xlu1 %v1470_v10, %s2393_s7  ;;  %v182_v10 = vpack.c.bf16 %v166_v2, %v166_v2  ;;  %v1476_v30 = vrot.slane %v1474_v18, 1 }
  0xcf   :  { %v1118_v19 = vshrl.u32 %v1077_v4, 16 }
  0xd0   :  { %v290_v12 = vshrl.u32 %v182_v10, 16  ;;  %v293_v13 = vshll.u32 %v182_v10, 16  ;;  %v1477_v47 = vor.u32 %v1476_v30, %v1472_v25  ;;  %v629_v30 = vld [vmem:[#allocation2 + $0x30] sm:$0xe] }
  0xd1   :  { %v1621_v44 = vunpack.c.l.b16 %v629_v30 }
  0xd2   :  { %1667 = vrot.lane.b32.xlu0 %v1650_v21, %s2390_s25  ;;  %839 = vrot.lane.b32.xlu2 %v748_v22, %s2392_s6  ;;  %v292_v21 = vrot.slane %v290_v12, 7  ;;  %v612_v22 = vld [vmem:[#allocation2 + $0x2c] sm:$0x1] }
  0xd3   :  { %v1428_v40 = vunpack.c.l.b16 %v612_v22  ;;  %v139_v22 = vpop.f32.mrf.mxu0  ;;  %v519_v30 = vld [vmem:[#allocation2 + $0x3c] sm:$0x1] }
  0xd4   :  { %v296_v27 = vrot.slane %v292_v21, 4 }
  0xd5   :  { %v1444_v53 = vpack.c.b16 %v1428_v40, %v1348_v32  ;;  %v1636_v31 = vpack.c.b16 %v1428_v40, %v1620_v48  ;;  %v518_v48 = vld [vmem:[#allocation2 + $0x34] sm:$0x1] }
  0xd6   :  { %1205 = vrot.lane.b32.xlu1 %v1109_v26, %s2397_s15  ;;  %v295_v26 = vor.u32 %v293_v13, %v292_v21  ;;  %v446_v42 = vsel %vm2558_vm6, %v296_v27, %v445_v24  ;;  %v549_v13 = vld [vmem:[#allocation2 + $0x30] sm:$0xf]  ;;  %v565_v21 = vld [vmem:[#allocation2 + $0x34] sm:$0x1]  ;;  %v167_v24 = vmax.f32 %v139_v22, 0.0 }
  0xd7   :  { %447 = vst [vmem:[#allocation2 + $0x44] sm:$0x1] %v446_v42  ;;  %v1481_v50 = vshll.u32 %v1444_v53, 16  ;;  %v1652_v63 = vrot.slane %v1636_v31, 1  ;;  %v982_v25 = vunpack.c.l.b16 %v549_v13  ;;  %v457_v22 = vld [vmem:[#allocation2 + $0x64] sm:$0x1] }
  0xd8   :  { %v443_v41 = vsel %vm2553_vm5, %v295_v26, %v442_v23  ;;  %v1254_v23 = vunpack.c.l.b16 %v581_v15  ;;  %v1062_v26 = vunpack.c.l.b16 %v565_v21  ;;  %v183_v32 = vpack.c.bf16 %v167_v24, %v167_v24  ;;  %v454_v21 = vld [vmem:[#allocation2 + $0x60] sm:$0xf] }
  0xd9   :  { %444 = vst [vmem:[#allocation2 + $0x40] sm:$0xf] %v443_v41  ;;  %v1483_v5 = vrot.slane %v1481_v50, 1  ;;  %v998_v41 = vpack.c.b16 %v982_v25, %v982_v25 }
  0xda   :  { %1301 = vrot.lane.b32.xlu0 %v1283_v45, %s2396_s14  ;;  %1381 = vrot.lane.b32.xlu2 %v1363_v46, %s2394_s8  ;;  %v2668_v45 = vpop.permute.xlu2 %1391  ;;  %v684_v46 = vunpack.c.l.b16 %v517_v36  ;;  %v1270_v36 = vpack.c.b16 %v1062_v26, %v1254_v23  ;;  %v298_v38 = vshrl.u32 %v183_v32, 16  ;;  %v301_v40 = vshll.u32 %v183_v32, 16 }
  0xdc   :  { %v902_v51 = vpack.c.b16 %v684_v46, %v886_v37  ;;  %v710_v6 = vpack.c.b16 %v684_v46, %v683_v39  ;;  %v613_v37 = vld [vmem:[#allocation2 + $0x34] sm:$0x1]  ;;  %v1078_v46 = vpack.c.b16 %v1062_v26, %v982_v25  ;;  %v1286_v31 = vrot.slane %v1270_v36, 1 }
  0xdd   :  { %v686_v39 = vunpack.c.l.b16 %v518_v48 }
  0xde   :  { %1303 = vrot.lane.b32.xlu1 %v1284_v54, %s2396_s14  ;;  %v946_v54 = vpop.permute.xlu0 %945  ;;  %v918_v43 = vrot.slane %v902_v51, 1  ;;  %v759_v10 = vshll.u32 %v710_v6, 16  ;;  %v757_v17 = vshrl.u32 %v710_v6, 16  ;;  %v300_v51 = vrot.slane %v298_v38, 7 }
  0xdf   :  { %v2674_v59 = vsel %vm1746_vm8, %v1724_v49, %v946_v54  ;;  %v534_v49 = vld [vmem:[#allocation2 + $0x30] sm:$0xe] }
  0xe0   :  { %v761_v18 = vrot.slane %v759_v10, 1  ;;  %v502_v54 = vld [vmem:[#allocation2 + $0x30] sm:$0xf]  ;;  %v303_v34 = vor.u32 %v301_v40, %v300_v51  ;;  %v1125_v10 = vshrl.u32 %v1078_v46, 16 }
  0xe2   :  { %1015 = vrot.lane.b32.xlu0 %v996_v3, %s2395_s11  ;;  %1207 = vrot.lane.b32.xlu2 %v1116_v7, %s2397_s15  ;;  %v1479_v3 = vshrl.u32 %v1444_v53, 16  ;;  %v1269_v7 = vpack.c.b16 %v1061_v62, %v1253_v0  ;;  %v762_v27 = vor.u32 %v761_v18, %v757_v17  ;;  %v1429_v53 = vunpack.c.l.b16 %v613_v37  ;;  %v503_v37 = vld [vmem:[#allocation2 + $0x38] sm:$0xf] }
  0xe3   :  { %v1127_v62 = vshll.u32 %v1078_v46, 16  ;;  %v685_v0 = vunpack.c.l.b16 %v502_v54  ;;  %v630_v54 = vld [vmem:[#allocation2 + $0x38] sm:$0xe] }
  0xe4   :  { %v1484_v9 = vor.u32 %v1483_v5, %v1479_v3  ;;  %v1285_v12 = vrot.slane %v1269_v7, 1  ;;  %v1637_v61 = vpack.c.b16 %v1429_v53, %v1621_v44  ;;  %v449_v3 = vsel %vm2553_vm5, %v303_v34, %v448_v56  ;;  %v550_v56 = vld [vmem:[#allocation2 + $0x38] sm:$0xf] }
  0xe5   :  { %450 = vst [vmem:[#allocation2 + $0x58] sm:$0xf] %v449_v3  ;;  %v711_v18 = vpack.c.b16 %v686_v39, %v685_v0  ;;  %v687_v44 = vunpack.c.l.b16 %v503_v37  ;;  %v566_v0 = vld [vmem:[#allocation2 + $0x3c] sm:$0x1] }
  0xe6   :  { %937 = vrot.lane.b32.xlu1 %v917_v11, %s2391_s26  ;;  %v1120_v11 = vshll.u32 %v1077_v4, 16  ;;  %v598_v4 = vld [vmem:[#allocation2 + $0x38] sm:$0xf]  ;;  %v2697_v13 = vpop.permute.xlu0 %833 }
  0xe8   :  { %v1122_v20 = vrot.slane %v1120_v11, 1  ;;  %v1129_v11 = vrot.slane %v1127_v62, 1  ;;  %v983_v62 = vunpack.c.l.b16 %v550_v56 }
  0xea   :  { %1669 = vrot.lane.b32.xlu0 %v1651_v28, %s2390_s25  ;;  %841 = vrot.lane.b32.xlu2 %v755_v29, %s2392_s6  ;;  %v1123_v28 = vor.u32 %v1122_v20, %v1118_v19  ;;  %v597_v29 = vld [vmem:[#allocation2 + $0x30] sm:$0xf]  ;;  %v1350_v20 = vunpack.c.l.b16 %v598_v4  ;;  %v1130_v26 = vor.u32 %v1129_v11, %v1125_v10 }
  0xeb   :  { %v1349_v42 = vunpack.c.l.b16 %v597_v29  ;;  %v766_v29 = vshll.u32 %v711_v18, 16 }
  0xec   :  { %v1366_v38 = vpack.c.b16 %v1350_v20, %v1350_v20 }
  0xed   :  { %v1365_v52 = vpack.c.b16 %v1349_v42, %v1349_v42 }
  0xee   :  { %1573 = vrot.lane.b32.xlu1 %v1477_v47, %s2393_s7 }
  0xf2   :  { %1383 = vrot.lane.b32.xlu0 %v1364_v60, %s2394_s8  ;;  %939 = vrot.lane.b32.xlu2 %v918_v43, %s2391_s26  ;;  %v141_v60 = vpop.f32.mrf.mxu0  ;;  %v304_v43 = vrot.slane %v300_v51, 4  ;;  %v768_v51 = vrot.slane %v766_v29, 1 }
  0xf3   :  { %v168_v50 = vmax.f32 %v141_v60, 0.0 }
  0xf4   :  { %v2678_v2 = vpop.permute.xlu2 %1009  ;;  %v452_v5 = vsel %vm2558_vm6, %v304_v43, %v451_v57 }
  0xf5   :  { %v184_v6 = vpack.c.bf16 %v168_v50, %v168_v50  ;;  %453 = vst [vmem:[#allocation2 + $0x5c] sm:$0x1] %v452_v5 }
  0xf6   :  { %1671 = vrot.lane.b32.xlu1 %v1652_v63, %s2390_s25  ;;  %v887_v63 = vunpack.c.l.b16 %v534_v49  ;;  %v764_v49 = vshrl.u32 %v711_v18, 16  ;;  %v551_v18 = vld [vmem:[#allocation2 + $0x40] sm:$0xf] }
  0xf7   :  { %v306_v7 = vshrl.u32 %v184_v6, 16 }
  0xf8   :  { %v903_v17 = vpack.c.b16 %v686_v39, %v887_v63  ;;  %v769_v34 = vor.u32 %v768_v51, %v764_v49  ;;  %v999_v39 = vpack.c.b16 %v983_v62, %v983_v62 }
  0xf9   :  { %v308_v19 = vrot.slane %v306_v7, 7 }
  0xfa   :  { %1017 = vrot.lane.b32.xlu0 %v997_v8, %s2395_s11  ;;  %1575 = vrot.lane.b32.xlu2 %v1484_v9, %s2393_s7  ;;  %v309_v8 = vshll.u32 %v184_v6, 16  ;;  %v1653_v9 = vrot.slane %v1637_v61, 1  ;;  %v1622_v61 = vunpack.c.l.b16 %v630_v54 }
  0xfb   :  { %v312_v24 = vrot.slane %v308_v19, 4 }
  0xfc   :  { %v2683_v16 = vpop.permute.xlu2 %1297  ;;  %v311_v23 = vor.u32 %v309_v8, %v308_v19  ;;  %v582_v8 = vld [vmem:[#allocation2 + $0x38] sm:$0xe]  ;;  %v2726_v19 = vld [vmem:[#allocation2 + $0x44] sm:$0x1] }
  0xfd   :  { %v458_v36 = vsel %vm2558_vm6, %v312_v24, %v457_v22  ;;  %v1064_v37 = vunpack.c.l.b16 %v2726_v19 }
  0xfe   :  { %1305 = vrot.lane.b32.xlu1 %v1285_v12, %s2396_s14  ;;  %v1445_v12 = vpack.c.b16 %v1429_v53, %v1349_v42  ;;  %v455_v32 = vsel %vm2553_vm5, %v311_v23, %v454_v21  ;;  %459 = vst [vmem:[#allocation2 + $0x64] sm:$0x1] %v458_v36  ;;  %v688_v42 = vunpack.c.l.b16 %v519_v30  ;;  %v614_v53 = vld [vmem:[#allocation2 + $0x3c] sm:$0x1]  ;;  %v2735_v36 = vunpack.c.l.b16 %v551_v18  ;;  %v2364_v18 = vld [vmem:[%s3369_s2] sm:$0xff] }
  0xff   :  { %456 = vst [vmem:[#allocation2 + $0x60] sm:$0xf] %v455_v32  ;;  %v1430_v50 = vunpack.c.l.b16 %v614_v53  ;;  %v599_v53 = vld [vmem:[#allocation2 + $0x40] sm:$0xf] }
 0x100   :  { %v1486_v40 = vshrl.u32 %v1445_v12, 16 }
 0x101   :  { %v1638_v4 = vpack.c.b16 %v1430_v50, %v1622_v61  ;;  %v1446_v7 = vpack.c.b16 %v1430_v50, %v1350_v20  ;;  %v1980_v20 = vld [vmem:[%s3369_s2 + $0x10] sm:$0x3]  ;;  %v2365_v50 = vld [vmem:[%s3369_s2 + $0x8] sm:$0xff] }
 0x102   :  { %843 = vrot.lane.b32.xlu0 %v762_v27, %s2392_s6  ;;  %1209 = vrot.lane.b32.xlu2 %v1123_v28, %s2397_s15  ;;  %v1488_v27 = vshll.u32 %v1445_v12, 16  ;;  %v919_v28 = vrot.slane %v903_v17, 1  ;;  %v1255_v17 = vunpack.c.l.b16 %v582_v8 }
 0x103   :  { %v1654_v23 = vrot.slane %v1638_v4, 1  ;;  %v1495_v24 = vshll.u32 %v1446_v7, 16  ;;  %v615_v4 = vld [vmem:[#allocation2 + $0x44] sm:$0x1] }
 0x104   :  { %v2688_v47 = vpop.permute.xlu2 %1011 }
 0x106   :  { %1019 = vrot.lane.b32.xlu1 %v998_v41, %s2395_s11  ;;  %v1490_v41 = vrot.slane %v1488_v27, 1  ;;  %v2030_v27 = vunpack.c.l.b16 %v1980_v20  ;;  %v1431_v20 = vunpack.c.l.b16 %v615_v4  ;;  %v2862_v55 = vld [vmem:[#allocation2 + $0x60] sm:$0xf] }
 0x108   :  { %v1491_v60 = vor.u32 %v1490_v41, %v1486_v40 }
 0x10a   :  { %1385 = vrot.lane.b32.xlu0 %v1365_v52, %s2394_s8  ;;  %1307 = vrot.lane.b32.xlu2 %v1286_v31, %s2396_s14  ;;  %v535_v52 = vld [vmem:[#allocation2 + $0x38] sm:$0xe]  ;;  %v712_v31 = vpack.c.b16 %v688_v42, %v687_v44 }
 0x10b   :  { %v888_v43 = vunpack.c.l.b16 %v535_v52 }
 0x10c   :  { %v2699_v15 = vpop.permute.xlu2 %1665  ;;  %v773_v63 = vshll.u32 %v712_v31, 16  ;;  %v771_v11 = vshrl.u32 %v712_v31, 16  ;;  %v1080_v31 = vpack.c.b16 %v1064_v37, %v2735_v36 }
 0x10d   :  { %v904_v6 = vpack.c.b16 %v688_v42, %v888_v43  ;;  %v1497_v42 = vrot.slane %v1495_v24, 1  ;;  %v463_v43 = vld [vmem:[#allocation2 + $0x6c] sm:$0x1] }
 0x10e   :  { %1673 = vrot.lane.b32.xlu1 %v1653_v9, %s2390_s25  ;;  %v1063_v9 = vunpack.c.l.b16 %v566_v0  ;;  %v775_v12 = vrot.slane %v773_v63, 1 }
 0x10f   :  { %v144_v21 = vpop.f32.mrf.mxu0  ;;  %v920_v22 = vrot.slane %v904_v6, 1  ;;  %v1351_v6 = vunpack.c.l.b16 %v599_v53  ;;  %v2772_v53 = vld [vmem:[#allocation2 + $0x5c] sm:$0x1] }
 0x110   :  { %v2702_v25 = vpop.permute.xlu1 %931  ;;  %v2733_v29 = vpack.c.b16 %v1063_v9, %v983_v62  ;;  %v776_v32 = vor.u32 %v775_v12, %v771_v11  ;;  %v1271_v44 = vpack.c.b16 %v1063_v9, %v1255_v17  ;;  %v1141_v12 = vshll.u32 %v1080_v31, 16 }
 0x111   :  { %v1367_v11 = vpack.c.b16 %v1351_v6, %v1351_v6 }
 0x112   :  { %1211 = vrot.lane.b32.xlu0 %v1130_v26, %s2397_s15  ;;  %941 = vrot.lane.b32.xlu2 %v919_v28, %s2391_s26  ;;  %v169_v26 = vmax.f32 %v144_v21, 0.0  ;;  %v1493_v28 = vshrl.u32 %v1446_v7, 16 }
 0x114   :  { %v2710_v46 = vpop.permute.xlu0 %835  ;;  %v2712_v48 = vpop.permute.xlu2 %1595  ;;  %v185_v30 = vpack.c.bf16 %v169_v26, %v169_v26  ;;  %v1498_v62 = vor.u32 %v1497_v42, %v1493_v28  ;;  %v583_v26 = vld [vmem:[#allocation2 + $0x40] sm:$0xe]  ;;  %v537_v42 = vld [vmem:[#allocation2 + $0x58] sm:$0xe] }
 0x116   :  { %1387 = vrot.lane.b32.xlu1 %v1366_v38, %s2394_s8  ;;  %v2033_v38 = vpack.c.b16 %v2030_v27, %v2030_v27  ;;  %v314_v49 = vshrl.u32 %v185_v30, 16  ;;  %v317_v51 = vshll.u32 %v185_v30, 16  ;;  %v631_v27 = vld [vmem:[#allocation2 + $0x40] sm:$0xe] }
 0x117   :  { %v146_v61 = vpop.f32.mrf.mxu0 }
 0x118   :  { %v2715_v57 = vpop.permute.xlu1 %1403  ;;  %v2063_v52 = vsel %vm2061_vm9, %v2033_v38, 0  ;;  %v316_v54 = vrot.slane %v314_v49, 7  ;;  %v170_v7 = vmax.f32 %v146_v61, 0.0  ;;  %v2768_v38 = vld [vmem:[#allocation2 + $0x5c] sm:$0x1]  ;;  %v1143_v49 = vrot.slane %v1141_v12, 1 }
 0x119   :  { %2070 = vmatpush.bf16.msra.mxu1 %v2063_v52  ;;  %2367 = vmatpush.bf16.msrb.mxu3 %v2063_v52  ;;  %v552_v52 = vld [vmem:[#allocation2 + $0x58] sm:$0xf]  ;;  %v692_v61 = vunpack.c.l.b16 %v2768_v38 }
 0x11a   :  { %845 = vrot.lane.b32.xlu0 %v769_v34, %s2392_s6  ;;  %1577 = vrot.lane.b32.xlu2 %v1491_v60, %s2393_s7  ;;  %v1134_v60 = vshll.u32 %v2733_v29, 16  ;;  %v460_v34 = vld [vmem:[#allocation2 + $0x68] sm:$0xf]  ;;  %v319_v63 = vor.u32 %v317_v51, %v316_v54  ;;  %v320_v0 = vrot.slane %v316_v54, 4  ;;  %v186_v17 = vpack.c.bf16 %v170_v7, %v170_v7 }
 0x11b   :  { %v1256_v51 = vunpack.c.l.b16 %v583_v26  ;;  %v2781_v7 = vunpack.c.l.b16 %v552_v52 }
 0x11c   :  { %v2719_v3 = vpop.permute.xlu0 %1201  ;;  %v2721_v5 = vpop.permute.xlu2 %1379  ;;  %v461_v8 = vsel %vm2553_vm5, %v319_v63, %v460_v34  ;;  %v464_v9 = vsel %vm2558_vm6, %v320_v0, %v463_v43  ;;  %v1136_v24 = vrot.slane %v1134_v60, 1  ;;  %v322_v28 = vshrl.u32 %v186_v17, 16  ;;  %v2381_v0 = vld [vmem:[#allocation2] sm:$0xf] }
 0x11d   :  { %462 = vst [vmem:[#allocation2 + $0x68] sm:$0xf] %v461_v8  ;;  %2071 = vmatpush.bf16.msra.mxu1 %v2365_v50  ;;  %2368 = vmatpush.bf16.msrb.mxu3 %v2365_v50  ;;  %v325_v30 = vshll.u32 %v186_v17, 16  ;;  %v1000_v60 = vpack.c.b16 %v2735_v36, %v2735_v36  ;;  %v1623_v34 = vunpack.c.l.b16 %v631_v27  ;;  %v1447_v43 = vpack.c.b16 %v1431_v20, %v1351_v6  ;;  %v469_v50 = vld [vmem:[#allocation2 + $0x74] sm:$0x1] }
 0x11e   :  { %1021 = vrot.lane.b32.xlu1 %v999_v39, %s2395_s11  ;;  %v1287_v39 = vrot.slane %v1271_v44, 1  ;;  %465 = vst [vmem:[#allocation2 + $0x6c] sm:$0x1] %v464_v9  ;;  %v1700_v4 = vsel %vm1697_vm7, %v2381_v0, %v2697_v13  ;;  %v1065_v36 = vunpack.c.l.b16 %v2772_v53  ;;  %v1272_v8 = vpack.c.b16 %v1064_v37, %v1256_v51  ;;  %v478_v53 = vld [vmem:[#allocation2 + $0x80] sm:$0xf] }
 0x11f   :  { %v1639_v17 = vpack.c.b16 %v1431_v20, %v1623_v34  ;;  %v1748_v19 = vsel %vm1746_vm8, %v1700_v4, %v2644_v35 }
 0x120   :  { %v2724_v10 = vpop.permute.xlu1 %1377  ;;  %v1081_v37 = vpack.c.b16 %v1065_v36, %v2781_v7  ;;  %v1781_v35 = vsel %vm1779_vm10, %v1748_v19, %v2678_v2 }
 0x121   :  { %2072 = vmatpush.bf16.msra.mxu1 %v2364_v18  ;;  %2369 = vmatpush.bf16.msrb.mxu3 %v2364_v18  ;;  %v1502_v18 = vshll.u32 %v1447_v43, 16  ;;  %v1655_v38 = vrot.slane %v1639_v17, 1 }
 0x122   :  { %943 = vrot.lane.b32.xlu0 %v920_v22, %s2391_s26  ;;  %1675 = vrot.lane.b32.xlu2 %v1654_v23, %s2390_s25  ;;  %v1132_v23 = vshrl.u32 %v2733_v29, 16  ;;  %v324_v29 = vrot.slane %v322_v28, 7  ;;  %v1288_v28 = vrot.slane %v1272_v8, 1  ;;  %v1146_v4 = vshrl.u32 %v1081_v37, 16  ;;  %v472_v8 = vld [vmem:[#allocation2 + $0x78] sm:$0xf] }
 0x123   :  { %v149_v26 = vpop.f32.mrf.mxu0 }
 0x124   :  { %v2738_v40 = vpop.permute.xlu0 %1691  ;;  %v2740_v41 = vpop.permute.xlu2 %1013  ;;  %v1137_v54 = vor.u32 %v1136_v24, %v1132_v23  ;;  %v328_v63 = vrot.slane %v324_v29, 4  ;;  %v505_v24 = vld [vmem:[#allocation2 + $0x58] sm:$0xf]  ;;  %v171_v20 = vmax.f32 %v149_v26, 0.0  ;;  %v2828_v26 = vld [vmem:[#allocation2 + $0x64] sm:$0x1] }
 0x125   :  { %v691_v52 = vunpack.c.l.b16 %v505_v24 }
 0x126   :  { %847 = vrot.lane.b32.xlu1 %v776_v32, %s2392_s6  ;;  %v1139_v32 = vshrl.u32 %v1080_v31, 16  ;;  %v466_v31 = vld [vmem:[#allocation2 + $0x70] sm:$0xf] }
 0x128   :  { %v2744_v56 = vpop.permute.xlu1 %1203  ;;  %v1144_v6 = vor.u32 %v1143_v49, %v1139_v32  ;;  %v1504_v49 = vrot.slane %v1502_v18, 1 }
 0x12a   :  { %1579 = vrot.lane.b32.xlu0 %v1498_v62, %s2393_s7  ;;  %1309 = vrot.lane.b32.xlu2 %v1287_v39, %s2396_s14  ;;  %v890_v62 = vunpack.c.l.b16 %v537_v42  ;;  %v327_v39 = vor.u32 %v325_v30, %v324_v29  ;;  %v2382_v30 = vld [vmem:[#allocation2 + $0x8] sm:$0xf]  ;;  %v1500_v42 = vshrl.u32 %v1447_v43, 16  ;;  %v187_v29 = vpack.c.bf16 %v171_v20, %v171_v20 }
 0x12b   :  { %v1703_v32 = vsel %vm1697_vm7, %v2382_v30, %v2710_v46 }
 0x12c   :  { %v2762_v21 = vpop.permute.xlu0 %1299  ;;  %v2764_v22 = vpop.permute.xlu2 %839  ;;  %v467_v9 = vsel %vm2553_vm5, %v327_v39, %v466_v31  ;;  %v906_v23 = vpack.c.b16 %v692_v61, %v890_v62  ;;  %v1750_v46 = vsel %vm1746_vm8, %v1703_v32, %v2702_v25  ;;  %v330_v34 = vshrl.u32 %v187_v29, 16  ;;  %v584_v62 = vld [vmem:[#allocation2 + $0x58] sm:$0xe]  ;;  %v569_v32 = vld [vmem:[#allocation2 + $0x64] sm:$0x1] }
 0x12d   :  { %468 = vst [vmem:[#allocation2 + $0x70] sm:$0xf] %v467_v9  ;;  %v333_v43 = vshll.u32 %v187_v29, 16  ;;  %v714_v39 = vpack.c.b16 %v692_v61, %v691_v52  ;;  %v1783_v0 = vsel %vm1779_vm10, %v1750_v46, %v2688_v47  ;;  %v475_v9 = vld [vmem:[#allocation2 + $0x7c] sm:$0x1]  ;;  %v1257_v18 = vunpack.c.l.b16 %v584_v62 }
 0x12e   :  { %1389 = vrot.lane.b32.xlu1 %v1367_v11, %s2394_s8  ;;  %v470_v11 = vsel %vm2558_vm6, %v328_v63, %v469_v50  ;;  %v922_v51 = vrot.slane %v906_v23, 1  ;;  %v1505_v50 = vor.u32 %v1504_v49, %v1500_v42  ;;  %v332_v63 = vrot.slane %v330_v34, 7  ;;  %v585_v23 = vld [vmem:[#allocation2 + $0x60] sm:$0xe] }
 0x12f   :  { %471 = vst [vmem:[#allocation2 + $0x74] sm:$0x1] %v470_v11  ;;  %v151_v11 = vpop.f32.mrf.mxu0  ;;  %v1815_v17 = vsel %vm85_vm0, %v1783_v0, %v2744_v56  ;;  %v1001_v47 = vpack.c.b16 %v2781_v7, %v2781_v7  ;;  %v787_v20 = vshll.u32 %v714_v39, 16 }
 0x130   :  { %v2770_v44 = vpop.permute.xlu1 %837  ;;  %v335_v19 = vor.u32 %v333_v43, %v332_v63  ;;  %v336_v61 = vrot.slane %v332_v63, 4  ;;  %v1848_v24 = vsel %vm1844_vm11, %v1815_v17, %v2762_v21 }
 0x131   :  { %v1881_v49 = vsel %vm1877_vm12, %v1848_v24, %v2721_v5  ;;  %v789_v5 = vrot.slane %v787_v20, 1 }
 0x132   :  { %1213 = vrot.lane.b32.xlu0 %v1137_v54, %s2397_s15  ;;  %1023 = vrot.lane.b32.xlu2 %v1000_v60, %s2395_s11  ;;  %v1813_v54 = vsel %vm85_vm0, %v1781_v35, %v2719_v3  ;;  %v1148_v60 = vshll.u32 %v1081_v37, 16  ;;  %v601_v37 = vld [vmem:[#allocation2 + $0x60] sm:$0xf]  ;;  %v473_v56 = vsel %vm2553_vm5, %v335_v19, %v472_v8  ;;  %v476_v30 = vsel %vm2558_vm6, %v336_v61, %v475_v9 }
 0x133   :  { %v1846_v3 = vsel %vm1844_vm11, %v1813_v54, %v2683_v16  ;;  %474 = vst [vmem:[#allocation2 + $0x78] sm:$0xf] %v473_v56  ;;  %v1353_v35 = vunpack.c.l.b16 %v601_v37  ;;  %v522_v37 = vld [vmem:[#allocation2 + $0x64] sm:$0x1] }
 0x134   :  { %v2790_v12 = vpop.permute.xlu0 %933  ;;  %v2792_v13 = vpop.permute.xlu2 %1381  ;;  %v1879_v25 = vsel %vm1877_vm12, %v1846_v3, %v2724_v10  ;;  %477 = vst [vmem:[#allocation2 + $0x7c] sm:$0x1] %v476_v30  ;;  %v553_v3 = vld [vmem:[#allocation2 + $0x60] sm:$0xf]  ;;  %v694_v30 = vunpack.c.l.b16 %v522_v37  ;;  %v2897_v37 = vld [vmem:[#allocation2 + $0x68] sm:$0xf] }
 0x136   :  { %1215 = vrot.lane.b32.xlu1 %v1144_v6, %s2397_s15  ;;  %v1150_v6 = vrot.slane %v1148_v60, 1  ;;  %v1273_v60 = vpack.c.b16 %v1065_v36, %v1257_v18  ;;  %v481_v36 = vld [vmem:[#allocation2 + $0x84] sm:$0x1] }
 0x138   :  { %v2800_v27 = vpop.permute.xlu1 %935  ;;  %v1151_v21 = vor.u32 %v1150_v6, %v1146_v4  ;;  %v1289_v8 = vrot.slane %v1273_v60, 1 }
 0x13a   :  { %1311 = vrot.lane.b32.xlu0 %v1288_v28, %s2396_s14  ;;  %1677 = vrot.lane.b32.xlu2 %v1655_v38, %s2390_s25  ;;  %v172_v28 = vmax.f32 %v151_v11, 0.0  ;;  %v1258_v38 = vunpack.c.l.b16 %v585_v23 }
 0x13c   :  { %v1570_v2 = vpop.permute.xlu0 %1569  ;;  %v2812_v31 = vpop.permute.xlu2 %1207  ;;  %v188_v7 = vpack.c.bf16 %v172_v28, %v172_v28 }
 0x13d   :  { %v1912_v10 = vsel %vm1910_vm13, %v1879_v25, %v1570_v2  ;;  %v1066_v2 = vunpack.c.l.b16 %v569_v32  ;;  %v1369_v32 = vpack.c.b16 %v1353_v35, %v1353_v35 }
 0x13e   :  { %947 = vrot.lane.b32.xlu1 %v922_v51, %s2391_s26  ;;  %v1945_v42 = vsel %vm1943_vm14, %v1912_v10, %v2699_v15  ;;  %v1433_v51 = vunpack.c.l.b16 %v2828_v26  ;;  %v338_v46 = vshrl.u32 %v188_v7, 16  ;;  %v341_v34 = vshll.u32 %v188_v7, 16  ;;  %v633_v10 = vld [vmem:[#allocation2 + $0x60] sm:$0xe]  ;;  %v554_v7 = vld [vmem:[#allocation2 + $0x68] sm:$0xf] }
 0x13f   :  { %v785_v15 = vshrl.u32 %v714_v39, 16  ;;  %v1274_v0 = vpack.c.b16 %v1066_v2, %v1258_v38  ;;  %v1625_v56 = vunpack.c.l.b16 %v633_v10 }
 0x140   :  { %v1572_v16 = vpop.permute.xlu1 %1571  ;;  %v340_v63 = vrot.slane %v338_v46, 7  ;;  %v1449_v4 = vpack.c.b16 %v1433_v51, %v1353_v35  ;;  %v618_v35 = vld [vmem:[#allocation2 + $0x6c] sm:$0x1] }
 0x141   :  { %v1914_v52 = vsel %vm1910_vm13, %v1881_v49, %v1572_v16  ;;  %v790_v17 = vor.u32 %v789_v5, %v785_v15  ;;  %v986_v16 = vunpack.c.l.b16 %v553_v3  ;;  %v1290_v23 = vrot.slane %v1274_v0, 1  ;;  %v538_v15 = vld [vmem:[#allocation2 + $0x60] sm:$0xe]  ;;  %v602_v5 = vld [vmem:[#allocation2 + $0x68] sm:$0xf] }
 0x142   :  { %1581 = vrot.lane.b32.xlu0 %v1505_v50, %s2393_s7  ;;  %1025 = vrot.lane.b32.xlu2 %v1001_v47, %s2395_s11  ;;  %v1997_v50 = vunpack.c.l.b16 %v1945_v42  ;;  %v343_v9 = vor.u32 %v341_v34, %v340_v63  ;;  %v344_v11 = vrot.slane %v340_v63, 4  ;;  %v1516_v19 = vshll.u32 %v1449_v4, 16 }
 0x143   :  { %v1082_v47 = vpack.c.b16 %v1066_v2, %v986_v16  ;;  %v1514_v58 = vshrl.u32 %v1449_v4, 16  ;;  %v1002_v20 = vpack.c.b16 %v986_v16, %v986_v16  ;;  %v2383_v2 = vld [vmem:[#allocation2 + $0x10] sm:$0xf]  ;;  %v891_v0 = vunpack.c.l.b16 %v538_v15 }
 0x144   :  { %v1668_v29 = vpop.permute.xlu0 %1667  ;;  %v2842_v54 = vpop.permute.xlu2 %841  ;;  %v479_v39 = vsel %vm2553_vm5, %v343_v9, %v478_v53  ;;  %v482_v18 = vsel %vm2558_vm6, %v344_v11, %v481_v36  ;;  %v1518_v28 = vrot.slane %v1516_v19, 1  ;;  %v634_v53 = vld [vmem:[#allocation2 + $0x68] sm:$0xe]  ;;  %v1354_v9 = vunpack.c.l.b16 %v602_v5 }
 0x145   :  { %v1947_v43 = vsel %vm1943_vm14, %v1914_v52, %v1668_v29  ;;  %480 = vst [vmem:[#allocation2 + $0x80] sm:$0xf] %v479_v39  ;;  %v1155_v38 = vshll.u32 %v1082_v47, 16  ;;  %v1641_v29 = vpack.c.b16 %v1433_v51, %v1625_v56  ;;  %v1153_v46 = vshrl.u32 %v1082_v47, 16  ;;  %v523_v47 = vld [vmem:[#allocation2 + $0x6c] sm:$0x1] }
 0x146   :  { %1217 = vrot.lane.b32.xlu1 %v1151_v21, %s2397_s15  ;;  %v1998_v62 = vunpack.c.l.b16 %v1947_v43  ;;  %483 = vst [vmem:[#allocation2 + $0x84] sm:$0x1] %v482_v18  ;;  %v693_v21 = vunpack.c.l.b16 %v2862_v55  ;;  %v1519_v42 = vor.u32 %v1518_v28, %v1514_v58  ;;  %v2872_v43 = vunpack.c.l.b16 %v554_v7  ;;  %v2902_v28 = vld [vmem:[#allocation2 + $0x70] sm:$0xf] }
 0x147   :  { %v1157_v34 = vrot.slane %v1155_v38, 1  ;;  %v1657_v63 = vrot.slane %v1641_v29, 1  ;;  %v907_v39 = vpack.c.b16 %v694_v30, %v891_v0  ;;  %v696_v38 = vunpack.c.l.b16 %v523_v47  ;;  %v2933_v47 = vld [vmem:[#allocation2 + $0x78] sm:$0xf] }
 0x148   :  { %v2848_v25 = vpop.permute.xlu1 %1205  ;;  %v2013_v6 = vpack.c.b16 %v1998_v62, %v1997_v50  ;;  %v715_v60 = vpack.c.b16 %v694_v30, %v693_v21  ;;  %v1706_v50 = vsel %vm1697_vm7, %v2383_v2, %v2770_v44  ;;  %v1712_v62 = vsel %vm1697_vm7, %v2642_v33, %v2842_v54  ;;  %v2384_v54 = vld [vmem:[#allocation2 + $0x18] sm:$0xf] }
 0x149   :  { %v1158_v36 = vor.u32 %v1157_v34, %v1153_v46  ;;  %v1752_v44 = vsel %vm1746_vm8, %v1706_v50, %v2790_v12  ;;  %v1626_v33 = vunpack.c.l.b16 %v634_v53  ;;  %v1709_v11 = vsel %vm1697_vm7, %v2384_v54, %v2764_v22 }
 0x14a   :  { %2339 = vmatmul.msk.bf16.vlgmr.msra.gmra.mxu1 %vm2036_vm15, %v2013_v6  ;;  %1313 = vrot.lane.b32.xlu0 %v1289_v8, %s2396_s14  ;;  %v794_v4 = vshll.u32 %v715_v60, 16  ;;  %v1003_v6 = vpack.c.b16 %v2872_v43, %v2872_v43  ;;  %v1434_v8 = vunpack.c.l.b16 %v618_v35  ;;  %v792_v18 = vshrl.u32 %v715_v60, 16 }
 0x14b   :  { %851 = vrot.lane.b32.xlu2 %v790_v17, %s2392_s6  ;;  %v1754_v19 = vsel %vm1746_vm8, %v1709_v11, %v2800_v27  ;;  %v1785_v12 = vsel %vm1779_vm10, %v1752_v44, %v2740_v41  ;;  %v923_v41 = vrot.slane %v907_v39, 1  ;;  %v695_v7 = vunpack.c.l.b16 %v2897_v37 }
 0x14c   :  { %v2857_v61 = vpop.permute.xlu0 %1301  ;;  %v2859_v24 = vpop.permute.xlu2 %939  ;;  %v1450_v10 = vpack.c.b16 %v1434_v8, %v1354_v9  ;;  %v1817_v22 = vsel %vm85_vm0, %v1785_v12, %v2848_v25  ;;  %v1642_v30 = vpack.c.b16 %v1434_v8, %v1626_v33  ;;  %v1370_v53 = vpack.c.b16 %v1354_v9, %v1354_v9 }
 0x14d   :  { %v1850_v27 = vsel %vm1844_vm11, %v1817_v22, %v2857_v61  ;;  %v716_v5 = vpack.c.b16 %v696_v38, %v695_v7  ;;  %v556_v22 = vld [vmem:[#allocation2 + $0x78] sm:$0xf] }
 0x14e   :  { %1315 = vrot.lane.b32.xlu1 %v1290_v23, %s2396_s14  ;;  %v796_v23 = vrot.slane %v794_v4, 1  ;;  %v1523_v25 = vshll.u32 %v1450_v10, 16  ;;  %v1883_v60 = vsel %vm1877_vm12, %v1850_v27, %v2792_v13  ;;  %v1658_v46 = vrot.slane %v1642_v30, 1 }
 0x14f   :  { %v1521_v13 = vshrl.u32 %v1450_v10, 16  ;;  %v525_v10 = vld [vmem:[#allocation2 + $0x7c] sm:$0x1]  ;;  %v989_v7 = vunpack.c.l.b16 %v556_v22 }
 0x150   :  { %v2864_v26 = vpop.permute.xlu1 %1303  ;;  %v797_v21 = vor.u32 %v796_v23, %v792_v18  ;;  %v1525_v50 = vrot.slane %v1523_v25, 1  ;;  %v799_v23 = vshrl.u32 %v716_v5, 16 }
 0x152   :  { %1027 = vrot.lane.b32.xlu0 %v1002_v20, %s2395_s11  ;;  %v524_v20 = vld [vmem:[#allocation2 + $0x74] sm:$0x1]  ;;  %v1526_v33 = vor.u32 %v1525_v50, %v1521_v13  ;;  %v605_v50 = vld [vmem:[#allocation2 + $0x80] sm:$0xf] }
 0x153   :  { %1393 = vrot.lane.b32.xlu2 %v1369_v32, %s2394_s8  ;;  %v539_v32 = vld [vmem:[#allocation2 + $0x68] sm:$0xe]  ;;  %v698_v29 = vunpack.c.l.b16 %v524_v20  ;;  %v572_v20 = vld [vmem:[#allocation2 + $0x7c] sm:$0x1] }
 0x154   :  { %v1016_v49 = vpop.permute.xlu0 %1015  ;;  %v2869_v52 = vpop.permute.xlu2 %1575  ;;  %v892_v34 = vunpack.c.l.b16 %v539_v32  ;;  %v699_v32 = vunpack.c.l.b16 %v2933_v47  ;;  %v1069_v25 = vunpack.c.l.b16 %v572_v20 }
 0x155   :  { %v1787_v58 = vsel %vm1779_vm10, %v1754_v19, %v1016_v49  ;;  %v697_v49 = vunpack.c.l.b16 %v2902_v28 }
 0x156   :  { %1585 = vrot.lane.b32.xlu1 %v1519_v42, %s2393_s7  ;;  %v1819_v42 = vsel %vm85_vm0, %v1787_v58, %v2812_v31  ;;  %v908_v4 = vpack.c.b16 %v696_v38, %v892_v34  ;;  %v541_v58 = vld [vmem:[#allocation2 + $0x78] sm:$0xe] }
 0x157   :  { %v1852_v15 = vsel %vm1844_vm11, %v1819_v42, %v2864_v26  ;;  %v894_v42 = vunpack.c.l.b16 %v541_v58 }
 0x158   :  { %v938_v3 = vpop.permute.xlu1 %937 }
 0x159   :  { %v2880_v51 = vsel %vm1746_vm8, %v1712_v62, %v938_v3  ;;  %v717_v62 = vpack.c.b16 %v698_v29, %v697_v49 }
 0x15a   :  { %1681 = vrot.lane.b32.xlu0 %v1657_v63, %s2390_s25 }
 0x15b   :  { %1219 = vrot.lane.b32.xlu2 %v1158_v36, %s2397_s15  ;;  %v801_v36 = vshll.u32 %v716_v5, 16  ;;  %v808_v54 = vshll.u32 %v717_v62, 16  ;;  %v806_v9 = vshrl.u32 %v717_v62, 16  ;;  %v621_v62 = vld [vmem:[#allocation2 + $0x84] sm:$0x1] }
 0x15c   :  { %v1670_v17 = vpop.permute.xlu0 %1669  ;;  %v2890_v16 = vpop.permute.xlu2 %1209 }
 0x15d   :  { %v803_v19 = vrot.slane %v801_v36, 1  ;;  %v810_v12 = vrot.slane %v808_v54, 1  ;;  %v557_v54 = vld [vmem:[#allocation2 + $0x80] sm:$0xf] }
 0x15e   :  { %1029 = vrot.lane.b32.xlu1 %v1003_v6, %s2395_s11  ;;  %v540_v6 = vld [vmem:[#allocation2 + $0x70] sm:$0xe] }
 0x15f   :  { %v893_v39 = vunpack.c.l.b16 %v540_v6  ;;  %v804_v30 = vor.u32 %v803_v19, %v799_v23  ;;  %v811_v38 = vor.u32 %v810_v12, %v806_v9  ;;  %v555_v19 = vld [vmem:[#allocation2 + $0x70] sm:$0xf]  ;;  %v2956_v9 = vld [vmem:[#allocation2 + $0x74] sm:$0x1] }
 0x160   :  { %v1574_v56 = vpop.permute.xlu1 %1573 }
 0x161   :  { %v1916_v61 = vsel %vm1910_vm13, %v1883_v60, %v1574_v56  ;;  %v909_v56 = vpack.c.b16 %v698_v29, %v893_v39 }
 0x162   :  { %949 = vrot.lane.b32.xlu0 %v923_v41, %s2391_s26  ;;  %v1949_v3 = vsel %vm1943_vm14, %v1916_v61, %v1670_v17  ;;  %v924_v17 = vrot.slane %v908_v4, 1  ;;  %v700_v41 = vunpack.c.l.b16 %v525_v10  ;;  %v1357_v4 = vunpack.c.l.b16 %v605_v50 }
 0x163   :  { %853 = vrot.lane.b32.xlu2 %v797_v21, %s2392_s6  ;;  %v1999_v8 = vunpack.c.l.b16 %v1949_v3  ;;  %v588_v21 = vld [vmem:[#allocation2 + $0x78] sm:$0xe]  ;;  %v925_v49 = vrot.slane %v909_v56, 1  ;;  %v990_v10 = vunpack.c.l.b16 %v557_v54  ;;  %v2959_v56 = vunpack.c.l.b16 %v555_v19 }
 0x164   :  { %v1384_v35 = vpop.permute.xlu0 %1383  ;;  %v2917_v31 = vpop.permute.xlu2 %1307  ;;  %v1261_v60 = vunpack.c.l.b16 %v588_v21  ;;  %v718_v29 = vpack.c.b16 %v700_v41, %v699_v32  ;;  %v910_v34 = vpack.c.b16 %v700_v41, %v894_v42 }
 0x165   :  { %v1885_v2 = vsel %vm1877_vm12, %v1852_v15, %v1384_v35  ;;  %v1085_v15 = vpack.c.b16 %v1069_v25, %v989_v7  ;;  %v1006_v41 = vpack.c.b16 %v990_v10, %v990_v10 }
 0x166   :  { %1683 = vrot.lane.b32.xlu1 %v1658_v46, %s2390_s25  ;;  %v1918_v0 = vsel %vm1910_vm13, %v1885_v2, %v2869_v52  ;;  %v1277_v5 = vpack.c.b16 %v1069_v25, %v1261_v60  ;;  %v1005_v2 = vpack.c.b16 %v989_v7, %v989_v7  ;;  %v815_v13 = vshll.u32 %v718_v29, 16  ;;  %v2968_v25 = vld [vmem:[#allocation2 + $0x6c] sm:$0x1] }
 0x167   :  { %v926_v3 = vrot.slane %v910_v34, 1  ;;  %v813_v6 = vshrl.u32 %v718_v29, 16 }
 0x168   :  { %v1672_v63 = vpop.permute.xlu1 %1671 }
 0x169   :  { %v1951_v26 = vsel %vm1943_vm14, %v1918_v0, %v1672_v63  ;;  %v1176_v63 = vshll.u32 %v1085_v15, 16  ;;  %v1293_v0 = vrot.slane %v1277_v5, 1  ;;  %v1373_v5 = vpack.c.b16 %v1357_v4, %v1357_v4 }
 0x16a   :  { %v2000_v44 = vunpack.c.l.b16 %v1951_v26  ;;  %1395 = vrot.lane.b32.xlu0 %v1370_v53, %s2394_s8  ;;  %v1437_v26 = vunpack.c.l.b16 %v621_v62 }
 0x16b   :  { %1587 = vrot.lane.b32.xlu2 %v1526_v33, %s2393_s7  ;;  %v1178_v33 = vrot.slane %v1176_v63, 1 }
 0x16c   :  { %v2014_v11 = vpack.c.b16 %v2000_v44, %v1999_v8  ;;  %v2927_v18 = vpop.permute.xlu0 %1017  ;;  %v2929_v52 = vpop.permute.xlu2 %941  ;;  %v817_v8 = vrot.slane %v815_v13, 1  ;;  %v1174_v44 = vshrl.u32 %v1085_v15, 16  ;;  %v1453_v23 = vpack.c.b16 %v1437_v26, %v1357_v4 }
 0x16d   :  { %v1067_v13 = vunpack.c.l.b16 %v2968_v25 }
 0x16e   :  { %2340 = vmatmul.msk.bf16.gmra.mxu1 %vm2036_vm15, %v2014_v11  ;;  %951 = vrot.lane.b32.xlu1 %v924_v17, %s2391_s26  ;;  %v573_v11 = vld [vmem:[#allocation2 + $0x84] sm:$0x1]  ;;  %v589_v17 = vld [vmem:[#allocation2 + $0x80] sm:$0xe]  ;;  %v818_v12 = vor.u32 %v817_v8, %v813_v6  ;;  %v1179_v58 = vor.u32 %v1178_v33, %v1174_v44  ;;  %v1544_v21 = vshll.u32 %v1453_v23, 16  ;;  %v1542_v34 = vshrl.u32 %v1453_v23, 16 }
 0x16f   :  { %v1070_v22 = vunpack.c.l.b16 %v573_v11  ;;  %v1262_v20 = vunpack.c.l.b16 %v589_v17  ;;  %v1083_v4 = vpack.c.b16 %v1067_v13, %v2872_v43  ;;  %v1789_v43 = vsel %vm1779_vm10, %v2880_v51, %v2927_v18  ;;  %v3005_v51 = vld [vmem:[#allocation2 + $0x74] sm:$0x1] }
 0x170   :  { %v2935_v27 = vpop.permute.xlu1 %1305  ;;  %v1546_v15 = vrot.slane %v1544_v21, 1  ;;  %v1821_v18 = vsel %vm85_vm0, %v1789_v43, %v2890_v16  ;;  %v3020_v16 = vld [vmem:[#allocation2 + $0x84] sm:$0x1] }
 0x171   :  { %v1086_v7 = vpack.c.b16 %v1070_v22, %v990_v10  ;;  %v1278_v42 = vpack.c.b16 %v1070_v22, %v1262_v20  ;;  %v1162_v19 = vshll.u32 %v1083_v4, 16  ;;  %v2988_v10 = vld [vmem:[#allocation2 + $0x7c] sm:$0x1]  ;;  %v2385_v20 = vld [vmem:[#allocation2 + $0x28] sm:$0xf] }
 0x172   :  { %855 = vrot.lane.b32.xlu0 %v804_v30, %s2392_s6  ;;  %v1068_v30 = vunpack.c.l.b16 %v2956_v9  ;;  %v1547_v63 = vor.u32 %v1546_v15, %v1542_v34  ;;  %v587_v15 = vld [vmem:[#allocation2 + $0x70] sm:$0xe] }
 0x173   :  { %857 = vrot.lane.b32.xlu2 %v811_v38, %s2392_s6  ;;  %v1294_v50 = vrot.slane %v1278_v42, 1  ;;  %v1181_v8 = vshrl.u32 %v1086_v7, 16  ;;  %v1164_v34 = vrot.slane %v1162_v19, 1 }
 0x174   :  { %v2940_v61 = vpop.permute.xlu0 %843  ;;  %v2942_v46 = vpop.permute.xlu2 %1577  ;;  %v1084_v60 = vpack.c.b16 %v1068_v30, %v2959_v56 }
 0x176   :  { %953 = vrot.lane.b32.xlu1 %v925_v49, %s2391_s26  ;;  %v637_v49 = vld [vmem:[#allocation2 + $0x80] sm:$0xe]  ;;  %v1167_v54 = vshrl.u32 %v1084_v60, 16 }
 0x177   :  { %v1629_v62 = vunpack.c.l.b16 %v637_v49 }
 0x178   :  { %v2945_v35 = vpop.permute.xlu1 %1019 }
 0x179   :  { %v1645_v33 = vpack.c.b16 %v1437_v26, %v1629_v62  ;;  %v1715_v26 = vsel %vm1697_vm7, %v2385_v20, %v2940_v61 }
 0x17a   :  { %1033 = vrot.lane.b32.xlu0 %v1005_v2, %s2395_s11  ;;  %v1183_v2 = vshll.u32 %v1086_v7, 16  ;;  %v1436_v7 = vunpack.c.l.b16 %v2988_v10  ;;  %v1758_v61 = vsel %vm1746_vm8, %v1715_v26, %v2859_v24 }
 0x17b   :  { %955 = vrot.lane.b32.xlu2 %v926_v3, %s2391_s26  ;;  %v1169_v3 = vshll.u32 %v1084_v60, 16  ;;  %v1661_v22 = vrot.slane %v1645_v33, 1  ;;  %v1160_v60 = vshrl.u32 %v1083_v4, 16  ;;  %v1791_v62 = vsel %vm1779_vm10, %v1758_v61, %v2945_v35 }
 0x17c   :  { %v2949_v53 = vpop.permute.xlu0 %1385  ;;  %v2951_v36 = vpop.permute.xlu2 %1675  ;;  %v1185_v44 = vrot.slane %v1183_v2, 1  ;;  %v586_v2 = vld [vmem:[#allocation2 + $0x68] sm:$0xe]  ;;  %v1435_v33 = vunpack.c.l.b16 %v3005_v51  ;;  %v1004_v35 = vpack.c.b16 %v2959_v56, %v2959_v56 }
 0x17d   :  { %v1171_v11 = vrot.slane %v1169_v3, 1 }
 0x17e   :  { %1321 = vrot.lane.b32.xlu1 %v1293_v0, %s2396_s14  ;;  %v1186_v23 = vor.u32 %v1185_v44, %v1181_v8  ;;  %v3018_v44 = vld [vmem:[#allocation2 + $0x80] sm:$0xf] }
 0x180   :  { %v2954_v39 = vpop.permute.xlu1 %1673 }
 0x182   :  { %859 = vrot.lane.b32.xlu0 %v818_v12, %s2392_s6  ;;  %v604_v12 = vld [vmem:[#allocation2 + $0x78] sm:$0xf] }
 0x183   :  { %1225 = vrot.lane.b32.xlu2 %v1179_v58, %s2397_s15  ;;  %v1172_v58 = vor.u32 %v1171_v11, %v1167_v54  ;;  %v2997_v21 = vunpack.c.l.b16 %v604_v12  ;;  %v1259_v54 = vunpack.c.l.b16 %v586_v2  ;;  %v701_v11 = vunpack.c.l.b16 %v3018_v44 }
 0x184   :  { %v2963_v32 = vpop.permute.xlu0 %1211  ;;  %v2965_v38 = vpop.permute.xlu2 %1309 }
 0x185   :  { %v1452_v8 = vpack.c.b16 %v1436_v7, %v2997_v21  ;;  %v1823_v4 = vsel %vm85_vm0, %v1791_v62, %v2963_v32  ;;  %v1275_v26 = vpack.c.b16 %v1067_v13, %v1259_v54  ;;  %v2386_v62 = vld [vmem:[#allocation2 + $0x38] sm:$0xf] }
 0x186   :  { %1035 = vrot.lane.b32.xlu1 %v1006_v41, %s2395_s11  ;;  %v603_v41 = vld [vmem:[#allocation2 + $0x70] sm:$0xf] }
 0x187   :  { %v1537_v12 = vshll.u32 %v1452_v8, 16 }
 0x188   :  { %v2973_v29 = vpop.permute.xlu1 %1387 }
 0x18a   :  { %1401 = vrot.lane.b32.xlu0 %v1373_v5, %s2394_s8  ;;  %v1355_v5 = vunpack.c.l.b16 %v603_v41 }
 0x18b   :  { %1323 = vrot.lane.b32.xlu2 %v1294_v50, %s2396_s14  ;;  %v1854_v50 = vsel %vm1844_vm11, %v1821_v18, %v2935_v27  ;;  %v1165_v27 = vor.u32 %v1164_v34, %v1160_v60  ;;  %v1539_v34 = vrot.slane %v1537_v12, 1 }
 0x18c   :  { %v2978_v0 = vpop.permute.xlu0 %845  ;;  %v2980_v6 = vpop.permute.xlu2 %1023  ;;  %v1887_v24 = vsel %vm1877_vm12, %v1854_v50, %v2949_v53  ;;  %v1856_v53 = vsel %vm1844_vm11, %v1823_v4, %v2917_v31  ;;  %v1371_v32 = vpack.c.b16 %v1355_v5, %v1355_v5  ;;  %v527_v4 = vld [vmem:[#allocation2 + $0x8c] sm:$0x1] }
 0x18d   :  { %v1920_v19 = vsel %vm1910_vm13, %v1887_v24, %v2942_v46  ;;  %v1451_v46 = vpack.c.b16 %v1435_v33, %v1355_v5  ;;  %v1291_v5 = vrot.slane %v1275_v26, 1  ;;  %v636_v24 = vld [vmem:[#allocation2 + $0x78] sm:$0xe] }
 0x18e   :  { %1593 = vrot.lane.b32.xlu1 %v1547_v63, %s2393_s7  ;;  %v1260_v63 = vunpack.c.l.b16 %v587_v15  ;;  %v1953_v56 = vsel %vm1943_vm14, %v1920_v19, %v2954_v39 }
 0x18f   :  { %v2001_v41 = vunpack.c.l.b16 %v1953_v56  ;;  %v1530_v18 = vshll.u32 %v1451_v46, 16  ;;  %v1528_v2 = vshrl.u32 %v1451_v46, 16  ;;  %v1628_v56 = vunpack.c.l.b16 %v636_v24 }
 0x190   :  { %v2986_v17 = vpop.permute.xlu1 %1021  ;;  %v1276_v20 = vpack.c.b16 %v1068_v30, %v1260_v63  ;;  %v1535_v30 = vshrl.u32 %v1452_v8, 16 }
 0x191   :  { %v1532_v50 = vrot.slane %v1530_v18, 1 }
 0x192   :  { %1227 = vrot.lane.b32.xlu0 %v1186_v23, %s2397_s15  ;;  %v702_v23 = vunpack.c.l.b16 %v3020_v16  ;;  %v1292_v15 = vrot.slane %v1276_v20, 1  ;;  %v2387_v20 = vld [vmem:[#allocation2 + $0x30] sm:$0xf] }
 0x193   :  { %1689 = vrot.lane.b32.xlu2 %v1661_v22, %s2390_s25  ;;  %v1889_v22 = vsel %vm1877_vm12, %v1856_v53, %v2973_v29  ;;  %v543_v53 = vld [vmem:[#allocation2 + $0x88] sm:$0xe]  ;;  %v1533_v12 = vor.u32 %v1532_v50, %v1528_v2  ;;  %v1718_v46 = vsel %vm1697_vm7, %v2387_v20, %v2978_v0 }
 0x194   :  { %v3000_v42 = vpop.permute.xlu0 %943  ;;  %v3002_v49 = vpop.permute.xlu2 %1677  ;;  %v719_v29 = vpack.c.b16 %v702_v23, %v701_v11  ;;  %v1760_v0 = vsel %vm1746_vm8, %v1718_v46, %v2929_v52  ;;  %v591_v46 = vld [vmem:[#allocation2 + $0x90] sm:$0xe] }
 0x195   :  { %v1793_v18 = vsel %vm1779_vm10, %v1760_v0, %v2986_v17 }
 0x196   :  { %1223 = vrot.lane.b32.xlu1 %v1172_v58, %s2397_s15  ;;  %v822_v25 = vshll.u32 %v719_v29, 16  ;;  %v820_v11 = vshrl.u32 %v719_v29, 16  ;;  %v896_v29 = vunpack.c.l.b16 %v543_v53 }
 0x198   :  { %v848_v3 = vpop.permute.xlu1 %847  ;;  %v824_v19 = vrot.slane %v822_v25, 1 }
 0x199   :  { %v1721_v63 = vsel %vm1697_vm7, %v2386_v62, %v848_v3  ;;  %v558_v3 = vld [vmem:[#allocation2 + $0x88] sm:$0xf] }
 0x19a   :  { %1221 = vrot.lane.b32.xlu0 %v1165_v27, %s2397_s15  ;;  %v635_v27 = vld [vmem:[#allocation2 + $0x70] sm:$0xe] }
 0x19b   :  { %1031 = vrot.lane.b32.xlu2 %v1004_v35, %s2395_s11  ;;  %v3064_v35 = vld [vmem:[#allocation2 + $0x88] sm:$0xf]  ;;  %v1627_v26 = vunpack.c.l.b16 %v635_v27 }
 0x19c   :  { %v1580_v58 = vpop.permute.xlu0 %1579  ;;  %v3041_v43 = vpop.permute.xlu2 %1025 }
 0x19d   :  { %v1922_v31 = vsel %vm1910_vm13, %v1889_v22, %v1580_v58  ;;  %v704_v22 = vunpack.c.l.b16 %v527_v4  ;;  %v3068_v58 = vld [vmem:[#allocation2 + $0x8c] sm:$0x1] }
 0x19e   :  { %1397 = vrot.lane.b32.xlu1 %v1371_v32, %s2394_s8  ;;  %v1955_v39 = vsel %vm1943_vm14, %v1922_v31, %v2951_v36  ;;  %v1540_v36 = vor.u32 %v1539_v34, %v1535_v30  ;;  %v1762_v32 = vsel %vm1746_vm8, %v1721_v63, %v3000_v42  ;;  %v1372_v31 = vpack.c.b16 %v2997_v21, %v2997_v21 }
 0x19f   :  { %v2002_v60 = vunpack.c.l.b16 %v1955_v39  ;;  %v703_v39 = vunpack.c.l.b16 %v3064_v35  ;;  %v1795_v42 = vsel %vm1779_vm10, %v1762_v32, %v2980_v6  ;;  %v1071_v30 = vunpack.c.l.b16 %v3068_v58 }
 0x1a0   :  { %v3055_v9 = vpop.permute.xlu1 %1389  ;;  %v912_v2 = vpack.c.b16 %v704_v22, %v896_v29 }
 0x1a1   :  { %v2015_v61 = vpack.c.b16 %v2002_v60, %v2001_v41  ;;  %v825_v41 = vor.u32 %v824_v19, %v820_v11  ;;  %v3079_v60 = vunpack.c.l.b16 %v558_v3  ;;  %v720_v52 = vpack.c.b16 %v704_v22, %v703_v39  ;;  %v575_v22 = vld [vmem:[#allocation2 + $0x94] sm:$0x1] }
 0x1a2   :  { %1319 = vrot.lane.b32.xlu0 %v1292_v15, %s2396_s14  ;;  %v1644_v15 = vpack.c.b16 %v1436_v7, %v1628_v56  ;;  %v928_v24 = vrot.slane %v912_v2, 1  ;;  %v559_v56 = vld [vmem:[#allocation2 + $0x90] sm:$0xf]  ;;  %v3127_v39 = vld [vmem:[#allocation2 + $0x94] sm:$0x1]  ;;  %v1072_v0 = vunpack.c.l.b16 %v575_v22 }
 0x1a3   :  { %2341 = vmatmul.msk.bf16.gmra.mxu1 %vm2036_vm15, %v2015_v61  ;;  %1317 = vrot.lane.b32.xlu2 %v1291_v5, %s2396_s14  ;;  %v1643_v5 = vpack.c.b16 %v1435_v33, %v1627_v26  ;;  %v1087_v17 = vpack.c.b16 %v1071_v30, %v3079_v60  ;;  %v827_v32 = vshrl.u32 %v720_v52, 16  ;;  %v607_v26 = vld [vmem:[#allocation2 + $0x90] sm:$0xf] }
 0x1a4   :  { %v1214_v13 = vpop.permute.xlu0 %1213  ;;  %v1660_v50 = vrot.slane %v1644_v15, 1  ;;  %v1439_v15 = vunpack.c.l.b16 %v3127_v39 }
 0x1a5   :  { %v3061_v8 = vpop.permute.xlu2 %851  ;;  %v1825_v25 = vsel %vm85_vm0, %v1793_v18, %v1214_v13  ;;  %v1659_v63 = vrot.slane %v1643_v5, 1  ;;  %v829_v13 = vshll.u32 %v720_v52, 16  ;;  %v1190_v4 = vshll.u32 %v1087_v17, 16  ;;  %v590_v5 = vld [vmem:[#allocation2 + $0x88] sm:$0xe] }
 0x1a6   :  { %1591 = vrot.lane.b32.xlu1 %v1540_v36, %s2393_s7  ;;  %v542_v36 = vld [vmem:[#allocation2 + $0x80] sm:$0xe]  ;;  %v1858_v51 = vsel %vm1844_vm11, %v1825_v25, %v2965_v38 }
 0x1a7   :  { %v895_v62 = vunpack.c.l.b16 %v542_v36  ;;  %v1891_v38 = vsel %vm1877_vm12, %v1858_v51, %v3055_v9  ;;  %v1192_v20 = vrot.slane %v1190_v4, 1  ;;  %v608_v4 = vld [vmem:[#allocation2 + $0x98] sm:$0xf] }
 0x1a8   :  { %v1216_v54 = vpop.permute.xlu1 %1215 }
 0x1a9   :  { %v1827_v21 = vsel %vm85_vm0, %v1795_v42, %v1216_v54 }
 0x1aa   :  { %1589 = vrot.lane.b32.xlu0 %v1533_v12, %s2393_s7  ;;  %v831_v12 = vrot.slane %v829_v13, 1 }
 0x1ab   :  { %1399 = vrot.lane.b32.xlu2 %v1372_v31, %s2394_s8 }
 0x1ac   :  { %v1312_v34 = vpop.permute.xlu0 %1311  ;;  %v832_v42 = vor.u32 %v831_v12, %v827_v32 }
 0x1ad   :  { %v1860_v6 = vsel %vm1844_vm11, %v1827_v21, %v1312_v34  ;;  %v3090_v61 = vpop.permute.xlu2 %1393  ;;  %v1264_v21 = vunpack.c.l.b16 %v591_v46  ;;  %v1359_v34 = vunpack.c.l.b16 %v607_v26 }
 0x1ae   :  { %861 = vrot.lane.b32.xlu1 %v825_v41, %s2392_s6  ;;  %v1893_v10 = vsel %vm1877_vm12, %v1860_v6, %v2668_v45  ;;  %v2138_v45 = vld [vmem:[%s3370_s3] sm:$0x3]  ;;  %v992_v41 = vunpack.c.l.b16 %v559_v56 }
 0x1af   :  { %v1926_v33 = vsel %vm1910_vm13, %v1893_v10, %v2651_v1  ;;  %v2168_v27 = vsel %vm2061_vm9, %v2138_v45, 0  ;;  %v911_v1 = vpack.c.b16 %v702_v23, %v895_v62  ;;  %v1280_v25 = vpack.c.b16 %v1072_v0, %v1264_v21 }
 0x1b0   :  { %v3098_v7 = vpop.permute.xlu1 %947  ;;  %v1959_v11 = vsel %vm1943_vm14, %v1926_v33, %v2659_v14  ;;  %2177 = vmatpush.bf16.msra.mxu2 %v2168_v27  ;;  %2370 = vmatpush.bf16.msra.mxu3 %v2168_v27  ;;  %v1188_v14 = vshrl.u32 %v1087_v17, 16  ;;  %v1088_v36 = vpack.c.b16 %v1072_v0, %v992_v41  ;;  %v1455_v10 = vpack.c.b16 %v1439_v15, %v1359_v34  ;;  %v624_v27 = vld [vmem:[#allocation2 + $0x9c] sm:$0x1] }
 0x1b1   :  { %v2004_v3 = vunpack.c.l.b16 %v1959_v11  ;;  %v927_v31 = vrot.slane %v911_v1, 1  ;;  %v1008_v2 = vpack.c.b16 %v992_v41, %v992_v41  ;;  %v1263_v17 = vunpack.c.l.b16 %v590_v5 }
 0x1b2   :  { %1687 = vrot.lane.b32.xlu0 %v1660_v50, %s2390_s25  ;;  %v1007_v50 = vpack.c.b16 %v3079_v60, %v3079_v60  ;;  %v1197_v62 = vshll.u32 %v1088_v36, 16  ;;  %v1296_v51 = vrot.slane %v1280_v25, 1  ;;  %v1558_v33 = vshll.u32 %v1455_v10, 16 }
 0x1b3   :  { %1685 = vrot.lane.b32.xlu2 %v1659_v63, %s2390_s25  ;;  %v1279_v13 = vpack.c.b16 %v1071_v30, %v1263_v17  ;;  %v1195_v1 = vshrl.u32 %v1088_v36, 16  ;;  %v1556_v32 = vshrl.u32 %v1455_v10, 16  ;;  %v1440_v56 = vunpack.c.l.b16 %v624_v27  ;;  %v2388_v10 = vld [vmem:[#allocation2 + $0x58] sm:$0xf] }
 0x1b4   :  { %v1582_v54 = vpop.permute.xlu0 %1581  ;;  %v1560_v11 = vrot.slane %v1558_v33, 1 }
 0x1b5   :  { %v1924_v19 = vsel %vm1910_vm13, %v1891_v38, %v1582_v54  ;;  %v3120_v53 = vpop.permute.xlu2 %1219  ;;  %v640_v38 = vld [vmem:[#allocation2 + $0x98] sm:$0xe] }
 0x1b6   :  { %959 = vrot.lane.b32.xlu1 %v928_v24, %s2391_s26  ;;  %v1957_v9 = vsel %vm1943_vm14, %v1924_v19, %v3002_v49  ;;  %v1193_v49 = vor.u32 %v1192_v20, %v1188_v14  ;;  %v1199_v24 = vrot.slane %v1197_v62, 1  ;;  %v1295_v19 = vrot.slane %v1279_v13, 1  ;;  %v639_v20 = vld [vmem:[#allocation2 + $0x90] sm:$0xe] }
 0x1b7   :  { %v2003_v16 = vunpack.c.l.b16 %v1957_v9  ;;  %v1360_v9 = vunpack.c.l.b16 %v608_v4  ;;  %v1632_v22 = vunpack.c.l.b16 %v640_v38  ;;  %v1561_v58 = vor.u32 %v1560_v11, %v1556_v32 }
 0x1b8   :  { %v3125_v23 = vpop.permute.xlu1 %1217  ;;  %v1200_v12 = vor.u32 %v1199_v24, %v1195_v1  ;;  %v1631_v0 = vunpack.c.l.b16 %v639_v20 }
 0x1b9   :  { %v2016_v29 = vpack.c.b16 %v2004_v3, %v2003_v16  ;;  %v1456_v30 = vpack.c.b16 %v1440_v56, %v1360_v9  ;;  %v1648_v14 = vpack.c.b16 %v1440_v56, %v1632_v22  ;;  %v1376_v46 = vpack.c.b16 %v1360_v9, %v1360_v9 }
 0x1ba   :  { %957 = vrot.lane.b32.xlu0 %v927_v31, %s2391_s26 }
 0x1bb   :  { %2342 = vmatmul.msk.bf16.gmra.mxu1 %vm2036_vm15, %v2016_v29  ;;  %863 = vrot.lane.b32.xlu2 %v832_v42, %s2392_s6  ;;  %v1565_v29 = vshll.u32 %v1456_v30, 16  ;;  %v1664_v21 = vrot.slane %v1648_v14, 1  ;;  %v1563_v36 = vshrl.u32 %v1456_v30, 16 }
 0x1bc   :  { %v3133_v18 = vpop.permute.xlu0 %1313 }
 0x1bd   :  { %v854_v6 = vpop.permute.xlu2 %853  ;;  %v1567_v25 = vrot.slane %v1565_v29, 1 }
 0x1be   :  { %1229 = vrot.lane.b32.xlu1 %v1193_v49, %s2397_s15  ;;  %v1375_v49 = vpack.c.b16 %v1359_v34, %v1359_v34  ;;  %v1730_v17 = vsel %vm1697_vm7, %v2862_v55, %v854_v6  ;;  %v1647_v34 = vpack.c.b16 %v1439_v15, %v1631_v0 }
 0x1bf   :  { %v1568_v39 = vor.u32 %v1567_v25, %v1563_v36 }
 0x1c0   :  { %v3136_v52 = vpop.permute.xlu1 %1315 }
 0x1c2   :  { %1039 = vrot.lane.b32.xlu0 %v1008_v2, %s2395_s11  ;;  %v1727_v2 = vsel %vm1697_vm7, %v2388_v10, %v3061_v8  ;;  %v1797_v8 = vsel %vm1779_vm10, %v2674_v59, %v3041_v43 }
 0x1c3   :  { %1037 = vrot.lane.b32.xlu2 %v1007_v50, %s2395_s11  ;;  %v1766_v62 = vsel %vm1746_vm8, %v1727_v2, %v3098_v7  ;;  %v1829_v6 = vsel %vm85_vm0, %v1797_v8, %v3125_v23  ;;  %v1663_v7 = vrot.slane %v1647_v34, 1 }
 0x1c4   :  { %v1028_v63 = vpop.permute.xlu0 %1027  ;;  %v1862_v15 = vsel %vm1844_vm11, %v1829_v6, %v3133_v18 }
 0x1c5   :  { %v3146_v45 = vpop.permute.xlu2 %1587  ;;  %v1799_v55 = vsel %vm1779_vm10, %v1766_v62, %v1028_v63  ;;  %v1895_v59 = vsel %vm1877_vm12, %v1862_v15, %v3090_v61 }
 0x1c6   :  { %1327 = vrot.lane.b32.xlu1 %v1296_v51, %s2396_s14  ;;  %v1831_v24 = vsel %vm85_vm0, %v1799_v55, %v3120_v53 }
 0x1c7   :  { %v2074_v60 = vpop.f32.mrf.mxu1  ;;  %v1864_v23 = vsel %vm1844_vm11, %v1831_v24, %v3136_v52 }
 0x1c8   :  { %v1586_v54 = vpop.permute.xlu1 %1585  ;;  %v2114_v42 = vmax.f32 %v2074_v60, 0.0 }
 0x1c9   :  { %v1928_v43 = vsel %vm1910_vm13, %v1895_v59, %v1586_v54 }
 0x1ca   :  { %1325 = vrot.lane.b32.xlu0 %v1295_v19, %s2396_s14 }
 0x1cb   :  { %1231 = vrot.lane.b32.xlu2 %v1200_v12, %s2397_s15 }
 0x1cc   :  { %v1682_v16 = vpop.permute.xlu0 %1681 }
 0x1cd   :  { %v3151_v3 = vpop.permute.xlu2 %857  ;;  %v1961_v63 = vsel %vm1943_vm14, %v1928_v43, %v1682_v16 }
 0x1ce   :  { %1597 = vrot.lane.b32.xlu1 %v1561_v58, %s2393_s7  ;;  %v2005_v61 = vunpack.c.l.b16 %v1961_v63 }
 0x1cf   :  { %v2076_v31 = vpop.f32.mrf.mxu1 }
 0x1d0   :  { %v1030_v26 = vpop.permute.xlu1 %1029  ;;  %v2115_v41 = vmax.f32 %v2076_v31, 0.0  ;;  %v1736_v31 = vsel %vm1697_vm7, %v2902_v28, %v3151_v3 }
 0x1d2   :  { %v2130_v5 = vpack.c.bf16 %v2115_v41, %v2114_v42  ;;  %1407 = vrot.lane.b32.xlu0 %v1376_v46, %s2394_s8 }
 0x1d3   :  { %1405 = vrot.lane.b32.xlu2 %v1375_v49, %s2394_s8 }
 0x1d4   :  { %2347 = vmatmul.msk.bf16.vlgmr.msra.gmra.mxu2 %vm1697_vm7, %v2130_v5  ;;  %v950_v50 = vpop.permute.xlu0 %949 }
 0x1d5   :  { %v1768_v51 = vsel %vm1746_vm8, %v1730_v17, %v950_v50  ;;  %v956_v33 = vpop.permute.xlu2 %955 }
 0x1d6   :  { %1695 = vrot.lane.b32.xlu1 %v1664_v21, %s2390_s25  ;;  %v3178_v4 = vsel %vm1779_vm10, %v1768_v51, %v1030_v26 }
 0x1d8   :  { %v1684_v13 = vpop.permute.xlu1 %1683 }
 0x1da   :  { %1693 = vrot.lane.b32.xlu0 %v1663_v7, %s2390_s25 }
 0x1db   :  { %1599 = vrot.lane.b32.xlu2 %v1568_v39, %s2393_s7 }
 0x1dc   :  { %v1396_v18 = vpop.permute.xlu0 %1395 }
 0x1dd   :  { %v1897_v53 = vsel %vm1877_vm12, %v1864_v23, %v1396_v18  ;;  %v1226_v27 = vpop.permute.xlu2 %1225 }
 0x1de   :  { %v1930_v38 = vsel %vm1910_vm13, %v1897_v53, %v3146_v45 }
 0x1df   :  { %v1963_v1 = vsel %vm1943_vm14, %v1930_v38, %v1684_v13 }
 0x1e0   :  { %v952_v60 = vpop.permute.xlu1 %951  ;;  %v2006_v11 = vunpack.c.l.b16 %v1963_v1 }
 0x1e2   :  { %v2017_v19 = vpack.c.b16 %v2006_v11, %v2005_v61 }
 0x1e4   :  { %2343 = vmatmul.msk.bf16.gmra.mxu1 %vm2036_vm15, %v2017_v19  ;;  %v856_v54 = vpop.permute.xlu0 %855 }
 0x1e5   :  { %v1324_v32 = vpop.permute.xlu2 %1323 }
 0x1e8   :  { %v954_v52 = vpop.permute.xlu1 %953 }
 0x1e9   :  { %v1772_v29 = vsel %vm1746_vm8, %v1736_v31, %v954_v52 }
 0x1eb   :  { %v2079_v12 = vpop.f32.mrf.mxu1 }
 0x1ec   :  { %v1034_v9 = vpop.permute.xlu0 %1033  ;;  %v2116_v30 = vmax.f32 %v2079_v12, 0.0 }
 0x1ed   :  { %v1690_v56 = vpop.permute.xlu2 %1689  ;;  %v1805_v42 = vsel %vm1779_vm10, %v1772_v29, %v1034_v9 }
 0x1ee   :  { %v1837_v49 = vsel %vm85_vm0, %v1805_v42, %v1226_v27 }
 0x1f0   :  { %v1322_v22 = vpop.permute.xlu1 %1321 }
 0x1f1   :  { %v1870_v21 = vsel %vm1844_vm11, %v1837_v49, %v1322_v22 }
 0x1f3   :  { %v2081_v58 = vpop.f32.mrf.mxu1 }
 0x1f4   :  { %v2117_v16 = vmax.f32 %v2081_v58, 0.0  ;;  %v860_v14 = vpop.permute.xlu0 %859 }
 0x1f5   :  { %v1032_v46 = vpop.permute.xlu2 %1031  ;;  %v1739_v0 = vsel %vm1697_vm7, %v2933_v47, %v860_v14 }
 0x1f6   :  { %v2131_v45 = vpack.c.bf16 %v2117_v16, %v2116_v30  ;;  %v1774_v5 = vsel %vm1746_vm8, %v1739_v0, %v956_v33 }
 0x1f8   :  { %2348 = vmatmul.msk.bf16.gmra.mxu2 %vm1697_vm7, %v2131_v45  ;;  %v1036_v20 = vpop.permute.xlu1 %1035 }
 0x1f9   :  { %v1807_v28 = vsel %vm1779_vm10, %v1774_v5, %v1036_v20 }
 0x1fc   :  { %v1402_v26 = vpop.permute.xlu0 %1401 }
 0x1fd   :  { %v1903_v36 = vsel %vm1877_vm12, %v1870_v21, %v1402_v26  ;;  %v1318_v25 = vpop.permute.xlu2 %1317 }
 0x200   :  { %v1594_v41 = vpop.permute.xlu1 %1593 }
 0x201   :  { %v1936_v3 = vsel %vm1910_vm13, %v1903_v36, %v1594_v41 }
 0x202   :  { %v1969_v47 = vsel %vm1943_vm14, %v1936_v3, %v1690_v56 }
 0x203   :  { %v2009_v33 = vunpack.c.l.b16 %v1969_v47 }
 0x204   :  { %v1228_v10 = vpop.permute.xlu0 %1227 }
 0x205   :  { %v1839_v2 = vsel %vm85_vm0, %v1807_v28, %v1228_v10  ;;  %v1400_v13 = vpop.permute.xlu2 %1399 }
 0x206   :  { %v1872_v17 = vsel %vm1844_vm11, %v1839_v2, %v1324_v32 }
 0x207   :  { %v1905_v50 = vsel %vm1877_vm12, %v1872_v17, %v2715_v57  ;;  %v1733_v57 = vsel %vm1697_vm7, %v2897_v37, %v856_v54 }
 0x208   :  { %v1224_v34 = vpop.permute.xlu1 %1223  ;;  %v1938_v62 = vsel %vm1910_vm13, %v1905_v50, %v2712_v48 }
 0x209   :  { %v1971_v51 = vsel %vm1943_vm14, %v1938_v62, %v2738_v40  ;;  %v1770_v40 = vsel %vm1746_vm8, %v1733_v57, %v952_v60  ;;  %v3260_v57 = vld [vmem:[%s3371_s4] ss:$0 sm:$0xff] }
 0x20a   :  { %v2010_v8 = vunpack.c.l.b16 %v1971_v51  ;;  %v1803_v43 = vsel %vm1779_vm10, %v1770_v40, %v1032_v46 }
 0x20b   :  { %v1835_v18 = vsel %vm85_vm0, %v1803_v43, %v1224_v34 }
 0x20c   :  { %v1222_v55 = vpop.permute.xlu0 %1221  ;;  %v2019_v6 = vpack.c.b16 %v2010_v8, %v2009_v33 }
 0x20d   :  { %v1686_v7 = vpop.permute.xlu2 %1685  ;;  %v1833_v48 = vsel %vm85_vm0, %v3178_v4, %v1222_v55 }
 0x20e   :  { %2345 = vmatmul.msk.bf16.vlgmr.msrb.gmra.mxu3 %vm2036_vm15, %v2019_v6  ;;  %v1866_v23 = vsel %vm1844_vm11, %v1833_v48, %v1318_v25 }
 0x210   :  { %v1398_v39 = vpop.permute.xlu1 %1397 }
 0x211   :  { %v1899_v63 = vsel %vm1877_vm12, %v1866_v23, %v1398_v39 }
 0x214   :  { %v1320_v15 = vpop.permute.xlu0 %1319 }
 0x215   :  { %v1868_v27 = vsel %vm1844_vm11, %v1835_v18, %v1320_v15  ;;  %v864_v1 = vpop.permute.xlu2 %863 }
 0x216   :  { %v1901_v4 = vsel %vm1877_vm12, %v1868_v27, %v1400_v13  ;;  %v1745_v41 = vsel %vm1697_vm7, %v3064_v35, %v864_v1 }
 0x218   :  { %v1592_v24 = vpop.permute.xlu1 %1591 }
 0x219   :  { %v1934_v60 = vsel %vm1910_vm13, %v1901_v4, %v1592_v24  ;;  %v21_v24 = vld [vmem:[%s3368_s0] sm:$0xff]  }
 0x21a   :  { %v2219_v48 = vunpack.c.l.bf16 %v21_v24  ;;  %v2220_v18 = vunpack.c.h.bf16 %v21_v24 }
 0x21c   :  { %v1590_v59 = vpop.permute.xlu0 %1589 }
 0x21d   :  { %v1932_v38 = vsel %vm1910_vm13, %v1899_v63, %v1590_v59  ;;  %v1038_v58 = vpop.permute.xlu2 %1037 }
 0x21e   :  { %v1965_v61 = vsel %vm1943_vm14, %v1932_v38, %v1686_v7 }
 0x21f   :  { %v2007_v54 = vunpack.c.l.b16 %v1965_v61 }
 0x220   :  { %v862_v53 = vpop.permute.xlu1 %861  ;;  %v2084_v37 = vpop.f32.mrf.mxu1 }
 0x221   :  { %v2118_v56 = vmax.f32 %v2084_v37, 0.0  ;;  %v1742_v36 = vsel %vm1697_vm7, %v3018_v44, %v862_v53 }
 0x224   :  { %v1688_v11 = vpop.permute.xlu0 %1687 }
 0x225   :  { %v1967_v19 = vsel %vm1943_vm14, %v1934_v60, %v1688_v11  ;;  %v1232_v20 = vpop.permute.xlu2 %1231  ;;  %v23_v11 = vld [vmem:[%s3368_s0 + $0x8] sm:$0xff]  }
 0x226   :  { %v2008_v32 = vunpack.c.l.b16 %v1967_v19  ;;  %v2221_v19 = vunpack.c.l.bf16 %v23_v11 }
 0x228   :  { %v960_v52 = vpop.permute.xlu1 %959  ;;  %v2086_v12 = vpop.f32.mrf.mxu1  ;;  %v2018_v9 = vpack.c.b16 %v2008_v32, %v2007_v54 }
 0x229   :  { %v2119_v22 = vmax.f32 %v2086_v12, 0.0  ;;  %v1778_v49 = vsel %vm1746_vm8, %v1745_v41, %v960_v52 }
 0x22a   :  { %2344 = vmatmul.msk.bf16.gmra.mxu1 %vm2036_vm15, %v2018_v9  ;;  %v2222_v9 = vunpack.c.h.bf16 %v23_v11 }
 0x22b   :  { %v2132_v30 = vpack.c.bf16 %v2119_v22, %v2118_v56 }
 0x22c   :  { %v958_v16 = vpop.permute.xlu0 %957 }
 0x22d   :  { %2349 = vmatmul.msk.bf16.gmra.mxu2 %vm1697_vm7, %v2132_v30  ;;  %v1406_v29 = vpop.permute.xlu2 %1405  ;;  %v1776_v28 = vsel %vm1746_vm8, %v1742_v36, %v958_v16 }
 0x22e   :  { %v1809_v35 = vsel %vm1779_vm10, %v1776_v28, %v1038_v58 }
 0x230   :  { %v1230_v14 = vpop.permute.xlu1 %1229 }
 0x231   :  { %v1841_v47 = vsel %vm85_vm0, %v1809_v35, %v1230_v14  ;;  %v25_v14 = vld [vmem:[%s3368_s0 + $0x10] sm:$0xff]  }
 0x234   :  { %v1040_v45 = vpop.permute.xlu0 %1039 }
 0x235   :  { %v1811_v25 = vsel %vm1779_vm10, %v1778_v49, %v1040_v45  ;;  %v1600_v34 = vpop.permute.xlu2 %1599 }
 0x236   :  { %v1843_v2 = vsel %vm85_vm0, %v1811_v25, %v1232_v20  ;;  %v2223_v20 = vunpack.c.l.bf16 %v25_v14 }
 0x238   :  { %v1328_v46 = vpop.permute.xlu1 %1327  ;;  %v2089_v31 = vpop.f32.mrf.mxu1 }
 0x239   :  { %v2120_v21 = vmax.f32 %v2089_v31, 0.0  ;;  %v1876_v17 = vsel %vm1844_vm11, %v1843_v2, %v1328_v46 }
 0x23c   :  { %v1326_v26 = vpop.permute.xlu0 %1325 }
 0x23d   :  { %v1874_v44 = vsel %vm1844_vm11, %v1841_v47, %v1326_v26 }
 0x23e   :  { %v1907_v33 = vsel %vm1877_vm12, %v1874_v44, %v1406_v29 }
 0x240   :  { %v1598_v42 = vpop.permute.xlu1 %1597  ;;  %v2091_v0 = vpop.f32.mrf.mxu1 }
 0x241   :  { %v2121_v5 = vmax.f32 %v2091_v0, 0.0  ;;  %v1940_v55 = vsel %vm1910_vm13, %v1907_v33, %v1598_v42 }
 0x243   :  { %v2133_v3 = vpack.c.bf16 %v2121_v5, %v2120_v21  ;;  %v2224_v21 = vunpack.c.h.bf16 %v25_v14 }
 0x244   :  { %v1408_v10 = vpop.permute.xlu0 %1407 }
 0x245   :  { %2350 = vmatmul.msk.bf16.gmra.mxu2 %vm1697_vm7, %v2133_v3  ;;  %v1909_v50 = vsel %vm1877_vm12, %v1876_v17, %v1408_v10  ;;  %v27_v17 = vld [vmem:[%s3368_s0 + $0x18] sm:$0xff]  }
 0x246   :  { %v1942_v51 = vsel %vm1910_vm13, %v1909_v50, %v1600_v34  ;;  %v2225_v47 = vunpack.c.l.bf16 %v27_v17 }
 0x248   :  { %v1696_v62 = vpop.permute.xlu1 %1695 }
 0x249   :  { %v1975_v8 = vsel %vm1943_vm14, %v1942_v51, %v1696_v62  ;;  %v2226_v51 = vunpack.c.h.bf16 %v27_v17 }
 0x24a   :  { %v2012_v39 = vunpack.c.l.b16 %v1975_v8 }
 0x24c   :  { %v1694_v6 = vpop.permute.xlu0 %1693 }
 0x24d   :  { %v1973_v13 = vsel %vm1943_vm14, %v1940_v55, %v1694_v6 }
 0x24e   :  { %v2011_v15 = vunpack.c.l.b16 %v1973_v13 }
 0x250   :  { %v2020_v7 = vpack.c.b16 %v2012_v39, %v2011_v15 }
 0x252   :  { %2346 = vmatmul.msk.bf16.gmra.mxu3 %vm2036_vm15, %v2020_v7 }
 0x257   :  { %v2179_v59 = vpop.f32.mrf.mxu2 }
 0x258   :  { %v2180_v40 = vadd.f32 %v3260_v57, %v2179_v59 }
 0x25a   :  { %v2235_v43 = vadd.f32 %v2219_v48, %v2180_v40  ;;  %v29_v48 = vld [vmem:[%s3368_s0 + $0x20] sm:$0xff]  }
 0x25b   :  { %v2227_v59 = vunpack.c.l.bf16 %v29_v48 }
 0x25c   :  { %v2251_v23 = vmax.f32 %v2235_v43, 0.0 }
 0x25e   :  { %2267 = vst.msk [vmem:[%s3372_s5] sm:$0xff] %vm85_vm0, %v2251_v23 }
 0x25f   :  { %v2181_v63 = vpop.f32.mrf.mxu2 }
 0x260   :  { %v2182_v53 = vadd.f32 %v3260_v57, %v2181_v63  ;;  %v2228_v63 = vunpack.c.h.bf16 %v29_v48 }
 0x261   :  { %v2094_v27 = vpop.f32.mrf.mxu1 }
 0x262   :  { %v2236_v38 = vadd.f32 %v2220_v18, %v2182_v53  ;;  %v2122_v4 = vmax.f32 %v2094_v27, 0.0 }
 0x264   :  { %v2252_v37 = vmax.f32 %v2236_v38, 0.0 }
 0x266   :  { %2268 = vst.msk [vmem:[%s3372_s5 + $0x8] sm:$0xff] %vm85_vm0, %v2252_v37 }
 0x269   :  { %v2096_v1 = vpop.f32.mrf.mxu1 }
 0x26a   :  { %v2123_v61 = vmax.f32 %v2096_v1, 0.0  ;;  %v31_v1 = vld [vmem:[%s3368_s0 + $0x28] sm:$0xff]  }
 0x26c   :  { %v2134_v60 = vpack.c.bf16 %v2123_v61, %v2122_v4  ;;  %v2229_v4 = vunpack.c.l.bf16 %v31_v1 }
 0x26e   :  { %2351 = vmatmul.msk.bf16.gmra.mxu2 %vm1697_vm7, %v2134_v60 }
 0x27b   :  { %v2184_v54 = vpop.f32.mrf.mxu2 }
 0x27c   :  { %v2185_v32 = vadd.f32 %v3260_v57, %v2184_v54  ;;  %v2230_v54 = vunpack.c.h.bf16 %v31_v1 }
 0x27e   :  { %v2237_v52 = vadd.f32 %v2221_v19, %v2185_v32 }
 0x280   :  { %v2253_v12 = vmax.f32 %v2237_v52, 0.0 }
 0x282   :  { %2269 = vst.msk [vmem:[%s3372_s5 + $0x10] sm:$0xff] %vm85_vm0, %v2253_v12 }
 0x283   :  { %v2186_v56 = vpop.f32.mrf.mxu2 }
 0x284   :  { %v2187_v22 = vadd.f32 %v3260_v57, %v2186_v56 }
 0x286   :  { %v2238_v58 = vadd.f32 %v2222_v9, %v2187_v22  ;;  %v33_v9 = vld [vmem:[%s3368_s0 + $0x30] sm:$0xff]  }
 0x287   :  { %v2231_v22 = vunpack.c.l.bf16 %v33_v9 }
 0x288   :  { %v2254_v30 = vmax.f32 %v2238_v58, 0.0 }
 0x28a   :  { %2270 = vst.msk [vmem:[%s3372_s5 + $0x18] sm:$0xff] %vm85_vm0, %v2254_v30 }
 0x291   :  { %v2104_v29 = vpop.f32.mrf.mxu3 }
 0x292   :  { %v2126_v2 = vmax.f32 %v2104_v29, 0.0  ;;  %v35_v29 = vld [vmem:[%s3368_s0 + $0x38] sm:$0xff]  }
 0x299   :  { %v2106_v25 = vpop.f32.mrf.mxu3 }
 0x29a   :  { %v2127_v10 = vmax.f32 %v2106_v25, 0.0 }
 0x29c   :  { %v2136_v35 = vpack.c.bf16 %v2127_v10, %v2126_v2 }
 0x2a7   :  { %v2099_v16 = vpop.f32.mrf.mxu1 }
 0x2a8   :  { %v2124_v46 = vmax.f32 %v2099_v16, 0.0 }
 0x2af   :  { %v2101_v45 = vpop.f32.mrf.mxu1 }
 0x2b0   :  { %v2125_v31 = vmax.f32 %v2101_v45, 0.0  ;;  %v2189_v26 = vpop.f32.mrf.mxu2  ;;  %v2232_v45 = vunpack.c.h.bf16 %v33_v9 }
 0x2b1   :  { %v2190_v42 = vadd.f32 %v3260_v57, %v2189_v26 }
 0x2b2   :  { %v2135_v41 = vpack.c.bf16 %v2125_v31, %v2124_v46 }
 0x2b3   :  { %v2239_v0 = vadd.f32 %v2223_v20, %v2190_v42  ;;  %v2233_v42 = vunpack.c.l.bf16 %v35_v29 }
 0x2b4   :  { %2352 = vmatmul.msk.bf16.gmra.mxu2 %vm1697_vm7, %v2135_v41 }
 0x2b5   :  { %v2255_v49 = vmax.f32 %v2239_v0, 0.0 }
 0x2b7   :  { %2271 = vst.msk [vmem:[%s3372_s5 + $0x20] sm:$0xff] %vm85_vm0, %v2255_v49 }
 0x2b8   :  { %v2191_v5 = vpop.f32.mrf.mxu2 }
 0x2b9   :  { %v2192_v36 = vadd.f32 %v3260_v57, %v2191_v5  ;;  %v2234_v5 = vunpack.c.h.bf16 %v35_v29 }
 0x2bb   :  { %v2240_v28 = vadd.f32 %v2224_v21, %v2192_v36 }
 0x2bd   :  { %v2256_v3 = vmax.f32 %v2240_v28, 0.0 }
 0x2bf   :  { %2272 = vst.msk [vmem:[%s3372_s5 + $0x28] sm:$0xff] %vm85_vm0, %v2256_v3 }
 0x2c4   :  { %2353 = vmatmul.msk.bf16.gmra.mxu2 %vm1697_vm7, %v2136_v35 }
 0x2c8   :  { %v2194_v50 = vpop.f32.mrf.mxu2 }
 0x2c9   :  { %v2195_v34 = vadd.f32 %v3260_v57, %v2194_v50 }
 0x2cb   :  { %v2241_v44 = vadd.f32 %v2225_v47, %v2195_v34 }
 0x2cd   :  { %v2257_v62 = vmax.f32 %v2241_v44, 0.0 }
 0x2cf   :  { %2273 = vst.msk [vmem:[%s3372_s5 + $0x30] sm:$0xff] %vm85_vm0, %v2257_v62 }
 0x2d0   :  { %v2196_v33 = vpop.f32.mrf.mxu2 }
 0x2d1   :  { %v2197_v8 = vadd.f32 %v3260_v57, %v2196_v33 }
 0x2d3   :  { %v2242_v55 = vadd.f32 %v2226_v51, %v2197_v8 }
 0x2d5   :  { %v2258_v6 = vmax.f32 %v2242_v55, 0.0  ;;  %v2109_v13 = vpop.f32.mrf.mxu3 }
 0x2d6   :  { %v2128_v15 = vmax.f32 %v2109_v13, 0.0 }
 0x2d7   :  { %2274 = vst.msk [vmem:[%s3372_s5 + $0x38] sm:$0xff] %vm85_vm0, %v2258_v6 }
 0x2dd   :  { %v2111_v39 = vpop.f32.mrf.mxu3 }
 0x2de   :  { %v2129_v7 = vmax.f32 %v2111_v39, 0.0 }
 0x2e0   :  { %v2137_v24 = vpack.c.bf16 %v2129_v7, %v2128_v15 }
 0x2e2   :  { %2354 = vmatmul.msk.bf16.vlgmr.msra.gmra.mxu3 %vm1697_vm7, %v2137_v24 }
 0x2f1   :  { %v2199_v40 = vpop.f32.mrf.mxu2 }
 0x2f2   :  { %v2200_v43 = vadd.f32 %v3260_v57, %v2199_v40 }
 0x2f4   :  { %v2243_v23 = vadd.f32 %v2227_v59, %v2200_v43 }
 0x2f6   :  { %v2259_v18 = vmax.f32 %v2243_v23, 0.0 }
 0x2f8   :  { %2275 = vst.msk [vmem:[%s3372_s5 + $0x40] sm:$0xff] %vm85_vm0, %v2259_v18 }
 0x2f9   :  { %v2201_v53 = vpop.f32.mrf.mxu2 }
 0x2fa   :  { %v2202_v27 = vadd.f32 %v3260_v57, %v2201_v53 }
 0x2fc   :  { %v2244_v38 = vadd.f32 %v2228_v63, %v2202_v27 }
 0x2fe   :  { %v2260_v37 = vmax.f32 %v2244_v38, 0.0 }
 0x300   :  { %2276 = vst.msk [vmem:[%s3372_s5 + $0x48] sm:$0xff] %vm85_vm0, %v2260_v37 }
 0x337   :  { %v2204_v61 = vpop.f32.mrf.mxu2 }
 0x338   :  { %v2205_v60 = vadd.f32 %v3260_v57, %v2204_v61 }
 0x33a   :  { %v2245_v11 = vadd.f32 %v2229_v4, %v2205_v60 }
 0x33c   :  { %v2261_v19 = vmax.f32 %v2245_v11, 0.0 }
 0x33e   :  { %2277 = vst.msk [vmem:[%s3372_s5 + $0x50] sm:$0xff] %vm85_vm0, %v2261_v19 }
 0x33f   :  { %v2206_v32 = vpop.f32.mrf.mxu2 }
 0x340   :  { %v2207_v52 = vadd.f32 %v3260_v57, %v2206_v32 }
 0x342   :  { %v2246_v12 = vadd.f32 %v2230_v54, %v2207_v52 }
 0x344   :  { %v2262_v56 = vmax.f32 %v2246_v12, 0.0 }
 0x346   :  { %2278 = vst.msk [vmem:[%s3372_s5 + $0x58] sm:$0xff] %vm85_vm0, %v2262_v56 }
 0x347   :  { %v2209_v58 = vpop.f32.mrf.mxu2 }
 0x348   :  { %v2210_v30 = vadd.f32 %v3260_v57, %v2209_v58 }
 0x34a   :  { %v2247_v16 = vadd.f32 %v2231_v22, %v2210_v30 }
 0x34c   :  { %v2263_v14 = vmax.f32 %v2247_v16, 0.0 }
 0x34e   :  { %2279 = vst.msk [vmem:[%s3372_s5 + $0x60] sm:$0xff] %vm85_vm0, %v2263_v14 }
 0x34f   :  { %v2211_v20 = vpop.f32.mrf.mxu2 }
 0x350   :  { %v2212_v46 = vadd.f32 %v3260_v57, %v2211_v20 }
 0x352   :  { %v2248_v31 = vadd.f32 %v2232_v45, %v2212_v46 }
 0x354   :  { %v2264_v26 = vmax.f32 %v2248_v31, 0.0 }
 0x356   :  { %2280 = vst.msk [vmem:[%s3372_s5 + $0x68] sm:$0xff] %vm85_vm0, %v2264_v26 }
 0x365   :  { %v2214_v41 = vpop.f32.mrf.mxu3 }
 0x366   :  { %v2215_v0 = vadd.f32 %v3260_v57, %v2214_v41 }
 0x368   :  { %v2249_v49 = vadd.f32 %v2233_v42, %v2215_v0 }
 0x36a   :  { %v2265_v21 = vmax.f32 %v2249_v49, 0.0 }
 0x36c   :  { %2281 = vst.msk [vmem:[%s3372_s5 + $0x70] sm:$0xff] %vm85_vm0, %v2265_v21 }
 0x36d   :  { %v2216_v36 = vpop.f32.mrf.mxu3 }
 0x36e   :  { %v2217_v25 = vadd.f32 %v3260_v57, %v2216_v36 }
 0x370   :  { %v2250_v28 = vadd.f32 %v2234_v5, %v2217_v25 }
 0x372   :  { %v2266_v3 = vmax.f32 %v2250_v28, 0.0 }
 0x374   :  { %2282 = vst.msk [vmem:[%s3372_s5 + $0x78] sm:$0xff] %vm85_vm0, %v2266_v3 }

</bundles_post_ra>
